<compile_context>
chip_gen: v7x
topology: tpu7x:2x2x1
jax: 0.10.0
libtpu: 0.0.40
codegen_flags: <defaults>
</compile_context>

<pallas_src>
import functools

import jax
import jax.numpy as jnp
from jax.experimental import pallas as pl
from jax.experimental.pallas import tpu as pltpu

LANE = 128      # TPU lane width: feature dims are padded to a multiple of this
SUBLANE = 8
MAX_BLOCK_ROWS = 1024   # keeps per-step VMEM well under the default scoped limit


def _round_up(v, m):
    return (v + m - 1) // m * m


def _pad2(a, rows, cols):
    return jnp.pad(a, ((0, rows - a.shape[0]), (0, cols - a.shape[1])))


def _choose_block_rows(n):
    """Row-tile size: >=2 blocks (v7x megacore), big blocks to amortize step overhead."""
    n8 = _round_up(max(int(n), 1), SUBLANE)
    if n8 <= 256:
        # small batch: split into 2 blocks so dimension_semantics=("parallel",) can
        # put one on each v7x TensorCore; sublane-aligned.
        return max(SUBLANE, _round_up(-(-n8 // 2), SUBLANE))
    # large batch: 256..1024-row tiles, ~>=4 blocks, amortizing the ~0.35 us/step cost.
    br = _round_up(-(-n8 // 4), 256)
    return int(min(max(br, 256), MAX_BLOCK_ROWS))


def transformer_kernel(x_ref,
                       w_e_ref, b_e_ref,          # folded embed + (I + W_v W_o)
                       g1_ref, be1_ref,            # LayerNorm 1 affine
                       w1_ref, b1_ref,             # FFN linear 1
                       w2_ref, b2_ref,             # FFN linear 2
                       w_fc_ref, b_fc_ref,         # head with LN2 affine folded in
                       out_ref,
                       *, inv_embed):
    inv_e = jnp.float32(inv_embed)
    eps = jnp.float32(1e-5)

    x = x_ref[...]                     # (TM, IN_pad), matmul dtype (bf16 or f32)
    cdt = x.dtype                      # MXU operand dtype; accumulation stays f32

    # embedding + seq_len==1 self-attention + residual, all folded into one matmul:
    #   z = x @ (W_emb (I + W_v W_o)) + (b_emb (I + W_v W_o) + b_v W_o + b_o)
    z = jnp.dot(x, w_e_ref[...], preferred_element_type=jnp.float32) + b_e_ref[...]

    # LayerNorm 1 over the true embed dim.  Padded lanes of z are exactly zero, so the
    # plain sums already equal sums over the real features; g1/be1 are zero in padded
    # lanes, which keeps padded lanes of h exactly zero.
    mu = jnp.sum(z, axis=-1, keepdims=True) * inv_e
    var = jnp.maximum(jnp.sum(z * z, axis=-1, keepdims=True) * inv_e - mu * mu, 0.0)
    h = (z - mu) * jax.lax.rsqrt(var + eps) * g1_ref[...] + be1_ref[...]

    # feed-forward: Linear -> ReLU -> Linear
    ff = jnp.dot(h.astype(cdt), w1_ref[...],
                 preferred_element_type=jnp.float32) + b1_ref[...]
    ff = jnp.maximum(ff, 0.0)
    ff = jnp.dot(ff.astype(cdt), w2_ref[...],
                 preferred_element_type=jnp.float32) + b2_ref[...]

    # LayerNorm 2 (pure normalize; its affine is folded into w_fc / b_fc)
    r = h + ff
    mu2 = jnp.sum(r, axis=-1, keepdims=True) * inv_e
    var2 = jnp.maximum(jnp.sum(r * r, axis=-1, keepdims=True) * inv_e - mu2 * mu2, 0.0)
    y = (r - mu2) * jax.lax.rsqrt(var2 + eps)

    # classification head (padded rows of w_fc are zero, so padded lanes of y are inert)
    out = jnp.dot(y.astype(cdt), w_fc_ref[...],
                  preferred_element_type=jnp.float32) + b_fc_ref[...]
    out_ref[...] = out.astype(out_ref.dtype)


def prepare_params(params, matmul_dtype=jnp.bfloat16):
    """One-time weight folding, lane padding and dtype casting (done in f32)."""
    IN, E = params["w_emb"].shape
    FF = params["w1"].shape[1]
    C = params["w_fc"].shape[1]

    # seq_len == 1  =>  softmax over one key == 1  =>  MHA(e) = e @ (W_v W_o) + (b_v W_o + b_o)
    w_vo = params["w_v"] @ params["w_o"]
    b_vo = params["b_v"] @ params["w_o"] + params["b_o"]
    m = jnp.eye(E, dtype=jnp.float32) + w_vo          # e + MHA(e) = e @ (I + W_vo) + b_vo
    w_e = params["w_emb"] @ m
    b_e = params["b_emb"] @ m + b_vo

    # fold LayerNorm-2 affine into the classifier head:
    #   (norm * g2 + be2) @ W_fc + b_fc  ==  norm @ (diag(g2) W_fc) + (be2 W_fc + b_fc)
    w_fc = params["g2"].reshape(-1, 1) * params["w_fc"]
    b_fc = params["be2"] @ params["w_fc"] + params["b_fc"]

    IN_p, E_p, FF_p, C_p = (_round_up(d, LANE) for d in (IN, E, FF, C))
    mm = matmul_dtype
    # LN1 affine folding into w1 is NOT done: h feeds both the FFN and the residual,
    # so the affine would still have to be materialized once either way.
    weights = (
        _pad2(w_e, IN_p, E_p).astype(mm),
        _pad2(b_e, 1, E_p),
        _pad2(params["g1"], 1, E_p),
        _pad2(params["be1"], 1, E_p),
        _pad2(params["w1"], E_p, FF_p).astype(mm),
        _pad2(params["b1"], 1, FF_p),
        _pad2(params["w2"], FF_p, E_p).astype(mm),
        _pad2(params["b2"], 1, E_p),
        _pad2(w_fc, E_p, C_p).astype(mm),
        _pad2(b_fc, 1, C_p),
    )
    meta = dict(input_size=IN, embed_size=E, num_classes=C,
                IN_p=IN_p, E_p=E_p, FF_p=FF_p, C_p=C_p)
    return weights, meta


def make_forward(params, *, matmul_dtype=jnp.bfloat16, out_dtype=jnp.float32,
                 block_rows=None):
    """Returns a jitted forward(x: (N, input_size) f32) -> (N, num_classes) f32."""
    weights, meta = prepare_params(params, matmul_dtype)
    IN_p, E_p, C_p = meta["IN_p"], meta["E_p"], meta["C_p"]
    C = meta["num_classes"]
    kernel = functools.partial(transformer_kernel,
                               inv_embed=1.0 / meta["embed_size"])

    @jax.jit
    def forward(x):
        N = x.shape[0]
        br = block_rows if block_rows is not None else _choose_block_rows(N)
        br = max(SUBLANE, _round_up(int(br), SUBLANE))
        N_p = _round_up(N, br)

        x_p = _pad2(x.astype(jnp.float32), N_p, IN_p).astype(matmul_dtype)

        # Weights/biases are identical for every grid step (constant index_map); they
        # total ~200 KB, so default buffering is irrelevant even on v7x's 64 MiB VMEM.
        in_specs = [pl.BlockSpec((br, IN_p), lambda i: (i, 0))]
        in_specs += [pl.BlockSpec(w.shape, lambda i: (0, 0)) for w in weights]
        out_spec = pl.BlockSpec((br, C_p), lambda i: (i, 0))

        out_p = pl.pallas_call(
            kernel,
            out_shape=jax.ShapeDtypeStruct((N_p, C_p), out_dtype),
            grid_spec=pltpu.PrefetchScalarGridSpec(
                num_scalar_prefetch=0,
                grid=(N_p // br,),
                in_specs=in_specs,
                out_specs=out_spec,
            ),
            compiler_params=pltpu.CompilerParams(
                dimension_semantics=("parallel",)),
        )(x_p, *weights)
        return out_p[:N, :C].astype(jnp.float32)

    return forward


def reference(x, params, heads):
    """Pure-JAX reference of the *full* PyTorch forward (incl. Q/K/softmax), f32."""
    def ln(v, g, b, eps=1e-5):
        mu = jnp.mean(v, axis=-1, keepdims=True)
        var = jnp.mean(jnp.square(v - mu), axis=-1, keepdims=True)
        return (v - mu) * jax.lax.rsqrt(var + eps) * g + b

    N = x.shape[0]
    E = params["w_emb"].shape[1]
    Dh = E // heads
    e = x @ params["w_emb"] + params["b_emb"]
    q = e @ params["w_q"] + params["b_q"]
    k = e @ params["w_k"] + params["b_k"]
    v = e @ params["w_v"] + params["b_v"]
    qh = q.reshape(N, heads, Dh)
    kh = k.reshape(N, heads, Dh)
    vh = v.reshape(N, heads, Dh)
    scores = jnp.sum(qh * kh, axis=-1, keepdims=True) / jnp.sqrt(jnp.float32(Dh))
    w = jax.nn.softmax(scores, axis=-1)          # seq_len == 1 -> exactly 1.0
    attn = (w * vh).reshape(N, E)
    sa = attn @ params["w_o"] + params["b_o"]
    h = ln(e + sa, params["g1"], params["be1"])
    ff = jnp.maximum(h @ params["w1"] + params["b1"], 0.0)
    ff = ff @ params["w2"] + params["b2"]
    y = ln(h + ff, params["g2"], params["be2"])
    return y @ params["w_fc"] + params["b_fc"]


def init_params(key, input_size, embed_size, forward_expansion, num_classes):
    ff = forward_expansion * embed_size
    names_shapes = [
        ("w_emb", (input_size, embed_size)), ("b_emb", (1, embed_size)),
        ("w_q", (embed_size, embed_size)), ("b_q", (1, embed_size)),
        ("w_k", (embed_size, embed_size)), ("b_k", (1, embed_size)),
        ("w_v", (embed_size, embed_size)), ("b_v", (1, embed_size)),
        ("w_o", (embed_size, embed_size)), ("b_o", (1, embed_size)),
        ("w1", (embed_size, ff)), ("b1", (1, ff)),
        ("w2", (ff, embed_size)), ("b2", (1, embed_size)),
        ("w_fc", (embed_size, num_classes)), ("b_fc", (1, num_classes)),
    ]
    keys = jax.random.split(key, len(names_shapes))
    params = {}
    for (name, shape), k in zip(names_shapes, keys):
        fan_in = shape[0] if name.startswith("w") else shape[1]
        params[name] = (jax.random.normal(k, shape, jnp.float32)
                        / jnp.sqrt(jnp.float32(fan_in)))
    params["g1"] = jnp.ones((1, embed_size), jnp.float32)
    params["be1"] = jnp.zeros((1, embed_size), jnp.float32)
    params["g2"] = jnp.ones((1, embed_size), jnp.float32)
    params["be2"] = jnp.zeros((1, embed_size), jnp.float32)
    return params


if __name__ == "__main__":
    # small, deterministic config (matches the module's constructor arguments)
    input_size = 16
    embed_size = 32
    heads = 4
    dropout = 0.0          # dropout == identity (eval / p = 0)
    forward_expansion = 4
    num_classes = 8
    N = 256                # rows -> batch of the seq-len-1 encoder; adaptive grid=(2,)

    # TODO(synk): src_key_padding_mask is only supported as None (mask=None path).

    key = jax.random.PRNGKey(0)
    kx, kp = jax.random.split(key)
    x = jax.random.normal(kx, (N, input_size), jnp.float32)
    params = init_params(kp, input_size, embed_size, forward_expansion, num_classes)

    # f32 matmul path: tight structural check of all the algebraic folds vs. the
    # full Q/K/softmax reference.  bf16 path: the fast path for the v6e/v7x MXU
    # (f32 accumulation / LayerNorm, bf16 logits writeback upcast outside).
    fwd_f32 = make_forward(params, matmul_dtype=jnp.float32, out_dtype=jnp.float32)
    fwd_bf16 = make_forward(params, matmul_dtype=jnp.bfloat16, out_dtype=jnp.bfloat16)

    out_f32 = jax.block_until_ready(fwd_f32(x))
    out_bf16 = jax.block_until_ready(fwd_bf16(x))

    ref = reference(x, params, heads)
    assert out_f32.shape == (N, num_classes)
    assert out_bf16.shape == (N, num_classes)
    assert jnp.allclose(out_f32, ref, atol=1e-3, rtol=1e-3), "f32 kernel mismatch"
    assert jnp.allclose(out_bf16, ref, atol=1e-1, rtol=1e-1), "bf16 kernel mismatch"

    print("KERNEL_OK")
</pallas_src>

<mosaic_0001>
module attributes {stable_mosaic.version = 11 : i64} {
  func.func @transformer_kernel(%arg0: i32, %arg1: memref<128x128xf32, #tpu.memory_space<vmem>>, %arg2: memref<128x128xf32, #tpu.memory_space<vmem>>, %arg3: memref<1x128xf32, #tpu.memory_space<vmem>>, %arg4: memref<1x128xf32, #tpu.memory_space<vmem>>, %arg5: memref<1x128xf32, #tpu.memory_space<vmem>>, %arg6: memref<128x128xf32, #tpu.memory_space<vmem>>, %arg7: memref<1x128xf32, #tpu.memory_space<vmem>>, %arg8: memref<128x128xf32, #tpu.memory_space<vmem>>, %arg9: memref<1x128xf32, #tpu.memory_space<vmem>>, %arg10: memref<128x128xf32, #tpu.memory_space<vmem>>, %arg11: memref<1x128xf32, #tpu.memory_space<vmem>>, %arg12: memref<128x128xf32, #tpu.memory_space<vmem>>) attributes {dimension_semantics = [#tpu.dimension_semantics<parallel>], iteration_bounds = array<i64: 2>, scalar_prefetch = 0 : i64, scratch_operands = 0 : i64, tpu.core_type = #tpu.core_type<tc>, window_params = [{transform_indices = @transform_0, window_bounds = array<i64: 128, 128>}, {pipeline_mode = #tpu.pipeline_mode<synchronous>, transform_indices = @transform_1, window_bounds = array<i64: 128, 128>}, {pipeline_mode = #tpu.pipeline_mode<synchronous>, transform_indices = @transform_2, window_bounds = array<i64: 1, 128>}, {pipeline_mode = #tpu.pipeline_mode<synchronous>, transform_indices = @transform_3, window_bounds = array<i64: 1, 128>}, {pipeline_mode = #tpu.pipeline_mode<synchronous>, transform_indices = @transform_4, window_bounds = array<i64: 1, 128>}, {pipeline_mode = #tpu.pipeline_mode<synchronous>, transform_indices = @transform_5, window_bounds = array<i64: 128, 128>}, {pipeline_mode = #tpu.pipeline_mode<synchronous>, transform_indices = @transform_6, window_bounds = array<i64: 1, 128>}, {pipeline_mode = #tpu.pipeline_mode<synchronous>, transform_indices = @transform_7, window_bounds = array<i64: 128, 128>}, {pipeline_mode = #tpu.pipeline_mode<synchronous>, transform_indices = @transform_8, window_bounds = array<i64: 1, 128>}, {pipeline_mode = #tpu.pipeline_mode<synchronous>, transform_indices = @transform_9, window_bounds = array<i64: 128, 128>}, {pipeline_mode = #tpu.pipeline_mode<synchronous>, transform_indices = @transform_10, window_bounds = array<i64: 1, 128>}, {transform_indices = @transform_11, window_bounds = array<i64: 128, 128>}]} {
    %c0 = arith.constant 0 : index
    %c0_0 = arith.constant 0 : index
    %0 = vector.load %arg1[%c0, %c0_0] : memref<128x128xf32, #tpu.memory_space<vmem>>, vector<128x128xf32>
    %c0_1 = arith.constant 0 : index
    %c0_2 = arith.constant 0 : index
    %1 = vector.load %arg2[%c0_1, %c0_2] : memref<128x128xf32, #tpu.memory_space<vmem>>, vector<128x128xf32>
    %cst = arith.constant dense<0.000000e+00> : vector<128x128xf32>
    %2 = tpu.matmul %0, %1, %cst {dimension_numbers = #tpu.dot_dimension_numbers<[1], [0], [0], [1], [0, 0, 1, 1], [], []>} : vector<128x128xf32>, vector<128x128xf32>, vector<128x128xf32> -> vector<128x128xf32>
    %c0_3 = arith.constant 0 : index
    %c0_4 = arith.constant 0 : index
    %3 = vector.load %arg3[%c0_3, %c0_4] : memref<1x128xf32, #tpu.memory_space<vmem>>, vector<1x128xf32>
    %4 = vector.broadcast %3 : vector<1x128xf32> to vector<128x128xf32>
    %5 = arith.addf %2, %4 : vector<128x128xf32>
    %cst_5 = arith.constant dense<0.000000e+00> : vector<128xf32>
    %6 = vector.multi_reduction <add>, %5, %cst_5 [1] : vector<128x128xf32> to vector<128xf32>
    %7 = vector.shape_cast %6 : vector<128xf32> to vector<128x1xf32>
    %cst_6 = arith.constant 3.125000e-02 : f32
    %8 = vector.broadcast %cst_6 : f32 to vector<128x1xf32>
    %9 = arith.mulf %7, %8 : vector<128x1xf32>
    %10 = arith.mulf %5, %5 : vector<128x128xf32>
    %cst_7 = arith.constant dense<0.000000e+00> : vector<128xf32>
    %11 = vector.multi_reduction <add>, %10, %cst_7 [1] : vector<128x128xf32> to vector<128xf32>
    %12 = vector.shape_cast %11 : vector<128xf32> to vector<128x1xf32>
    %cst_8 = arith.constant 3.125000e-02 : f32
    %13 = vector.broadcast %cst_8 : f32 to vector<128x1xf32>
    %14 = arith.mulf %12, %13 : vector<128x1xf32>
    %15 = arith.mulf %9, %9 : vector<128x1xf32>
    %16 = arith.subf %14, %15 : vector<128x1xf32>
    %cst_9 = arith.constant 0.000000e+00 : f32
    %17 = vector.broadcast %cst_9 : f32 to vector<128x1xf32>
    %18 = arith.maximumf %16, %17 : vector<128x1xf32>
    %19 = vector.broadcast %9 : vector<128x1xf32> to vector<128x128xf32>
    %20 = arith.subf %5, %19 : vector<128x128xf32>
    %cst_10 = arith.constant 9.99999974E-6 : f32
    %21 = vector.broadcast %cst_10 : f32 to vector<128x1xf32>
    %22 = arith.addf %18, %21 : vector<128x1xf32>
    %23 = math.rsqrt %22 : vector<128x1xf32>
    %24 = vector.broadcast %23 : vector<128x1xf32> to vector<128x128xf32>
    %25 = arith.mulf %20, %24 : vector<128x128xf32>
    %c0_11 = arith.constant 0 : index
    %c0_12 = arith.constant 0 : index
    %26 = vector.load %arg4[%c0_11, %c0_12] : memref<1x128xf32, #tpu.memory_space<vmem>>, vector<1x128xf32>
    %27 = vector.broadcast %26 : vector<1x128xf32> to vector<128x128xf32>
    %28 = arith.mulf %25, %27 : vector<128x128xf32>
    %c0_13 = arith.constant 0 : index
    %c0_14 = arith.constant 0 : index
    %29 = vector.load %arg5[%c0_13, %c0_14] : memref<1x128xf32, #tpu.memory_space<vmem>>, vector<1x128xf32>
    %30 = vector.broadcast %29 : vector<1x128xf32> to vector<128x128xf32>
    %31 = arith.addf %28, %30 : vector<128x128xf32>
    %c0_15 = arith.constant 0 : index
    %c0_16 = arith.constant 0 : index
    %32 = vector.load %arg6[%c0_15, %c0_16] : memref<128x128xf32, #tpu.memory_space<vmem>>, vector<128x128xf32>
    %cst_17 = arith.constant dense<0.000000e+00> : vector<128x128xf32>
    %33 = tpu.matmul %31, %32, %cst_17 {dimension_numbers = #tpu.dot_dimension_numbers<[1], [0], [0], [1], [0, 0, 1, 1], [], []>} : vector<128x128xf32>, vector<128x128xf32>, vector<128x128xf32> -> vector<128x128xf32>
    %c0_18 = arith.constant 0 : index
    %c0_19 = arith.constant 0 : index
    %34 = vector.load %arg7[%c0_18, %c0_19] : memref<1x128xf32, #tpu.memory_space<vmem>>, vector<1x128xf32>
    %35 = vector.broadcast %34 : vector<1x128xf32> to vector<128x128xf32>
    %36 = arith.addf %33, %35 : vector<128x128xf32>
    %cst_20 = arith.constant 0.000000e+00 : f32
    %37 = vector.broadcast %cst_20 : f32 to vector<128x128xf32>
    %38 = arith.maximumf %36, %37 : vector<128x128xf32>
    %c0_21 = arith.constant 0 : index
    %c0_22 = arith.constant 0 : index
    %39 = vector.load %arg8[%c0_21, %c0_22] : memref<128x128xf32, #tpu.memory_space<vmem>>, vector<128x128xf32>
    %cst_23 = arith.constant dense<0.000000e+00> : vector<128x128xf32>
    %40 = tpu.matmul %38, %39, %cst_23 {dimension_numbers = #tpu.dot_dimension_numbers<[1], [0], [0], [1], [0, 0, 1, 1], [], []>} : vector<128x128xf32>, vector<128x128xf32>, vector<128x128xf32> -> vector<128x128xf32>
    %c0_24 = arith.constant 0 : index
    %c0_25 = arith.constant 0 : index
    %41 = vector.load %arg9[%c0_24, %c0_25] : memref<1x128xf32, #tpu.memory_space<vmem>>, vector<1x128xf32>
    %42 = vector.broadcast %41 : vector<1x128xf32> to vector<128x128xf32>
    %43 = arith.addf %40, %42 : vector<128x128xf32>
    %44 = arith.addf %31, %43 : vector<128x128xf32>
    %cst_26 = arith.constant dense<0.000000e+00> : vector<128xf32>
    %45 = vector.multi_reduction <add>, %44, %cst_26 [1] : vector<128x128xf32> to vector<128xf32>
    %46 = vector.shape_cast %45 : vector<128xf32> to vector<128x1xf32>
    %cst_27 = arith.constant 3.125000e-02 : f32
    %47 = vector.broadcast %cst_27 : f32 to vector<128x1xf32>
    %48 = arith.mulf %46, %47 : vector<128x1xf32>
    %49 = arith.mulf %44, %44 : vector<128x128xf32>
    %cst_28 = arith.constant dense<0.000000e+00> : vector<128xf32>
    %50 = vector.multi_reduction <add>, %49, %cst_28 [1] : vector<128x128xf32> to vector<128xf32>
    %51 = vector.shape_cast %50 : vector<128xf32> to vector<128x1xf32>
    %cst_29 = arith.constant 3.125000e-02 : f32
    %52 = vector.broadcast %cst_29 : f32 to vector<128x1xf32>
    %53 = arith.mulf %51, %52 : vector<128x1xf32>
    %54 = arith.mulf %48, %48 : vector<128x1xf32>
    %55 = arith.subf %53, %54 : vector<128x1xf32>
    %cst_30 = arith.constant 0.000000e+00 : f32
    %56 = vector.broadcast %cst_30 : f32 to vector<128x1xf32>
    %57 = arith.maximumf %55, %56 : vector<128x1xf32>
    %58 = vector.broadcast %48 : vector<128x1xf32> to vector<128x128xf32>
    %59 = arith.subf %44, %58 : vector<128x128xf32>
    %cst_31 = arith.constant 9.99999974E-6 : f32
    %60 = vector.broadcast %cst_31 : f32 to vector<128x1xf32>
    %61 = arith.addf %57, %60 : vector<128x1xf32>
    %62 = math.rsqrt %61 : vector<128x1xf32>
    %63 = vector.broadcast %62 : vector<128x1xf32> to vector<128x128xf32>
    %64 = arith.mulf %59, %63 : vector<128x128xf32>
    %c0_32 = arith.constant 0 : index
    %c0_33 = arith.constant 0 : index
    %65 = vector.load %arg10[%c0_32, %c0_33] : memref<128x128xf32, #tpu.memory_space<vmem>>, vector<128x128xf32>
    %cst_34 = arith.constant dense<0.000000e+00> : vector<128x128xf32>
    %66 = tpu.matmul %64, %65, %cst_34 {dimension_numbers = #tpu.dot_dimension_numbers<[1], [0], [0], [1], [0, 0, 1, 1], [], []>} : vector<128x128xf32>, vector<128x128xf32>, vector<128x128xf32> -> vector<128x128xf32>
    %c0_35 = arith.constant 0 : index
    %c0_36 = arith.constant 0 : index
    %67 = vector.load %arg11[%c0_35, %c0_36] : memref<1x128xf32, #tpu.memory_space<vmem>>, vector<1x128xf32>
    %68 = vector.broadcast %67 : vector<1x128xf32> to vector<128x128xf32>
    %69 = arith.addf %66, %68 : vector<128x128xf32>
    %c0_37 = arith.constant 0 : index
    %c0_38 = arith.constant 0 : index
    %70 = vector.load %arg12[%c0_37, %c0_38] : memref<128x128xf32, #tpu.memory_space<vmem>>, vector<128x128xf32>
    tpu.vector_store %arg12[%c0_37, %c0_38], %69 {strides = array<i32>} : memref<128x128xf32, #tpu.memory_space<vmem>>, vector<128x128xf32>,
    return
  }
  func.func @transform_0(%arg0: i32) -> (i32, i32) {
    %c0_i32 = arith.constant 0 : i32
    %c0_i32_0 = arith.constant 0 : i32
    return %arg0, %c0_i32 : i32, i32
  }
  func.func @transform_1(%arg0: i32) -> (i32, i32) {
    %c0_i32 = arith.constant 0 : i32
    %c0_i32_0 = arith.constant 0 : i32
    %c0_i32_1 = arith.constant 0 : i32
    return %c0_i32, %c0_i32_0 : i32, i32
  }
  func.func @transform_2(%arg0: i32) -> (i32, i32) {
    %c0_i32 = arith.constant 0 : i32
    %c0_i32_0 = arith.constant 0 : i32
    %c0_i32_1 = arith.constant 0 : i32
    return %c0_i32, %c0_i32_0 : i32, i32
  }
  func.func @transform_3(%arg0: i32) -> (i32, i32) {
    %c0_i32 = arith.constant 0 : i32
    %c0_i32_0 = arith.constant 0 : i32
    %c0_i32_1 = arith.constant 0 : i32
    return %c0_i32, %c0_i32_0 : i32, i32
  }
  func.func @transform_4(%arg0: i32) -> (i32, i32) {
    %c0_i32 = arith.constant 0 : i32
    %c0_i32_0 = arith.constant 0 : i32
    %c0_i32_1 = arith.constant 0 : i32
    return %c0_i32, %c0_i32_0 : i32, i32
  }
  func.func @transform_5(%arg0: i32) -> (i32, i32) {
    %c0_i32 = arith.constant 0 : i32
    %c0_i32_0 = arith.constant 0 : i32
    %c0_i32_1 = arith.constant 0 : i32
    return %c0_i32, %c0_i32_0 : i32, i32
  }
  func.func @transform_6(%arg0: i32) -> (i32, i32) {
    %c0_i32 = arith.constant 0 : i32
    %c0_i32_0 = arith.constant 0 : i32
    %c0_i32_1 = arith.constant 0 : i32
    return %c0_i32, %c0_i32_0 : i32, i32
  }
  func.func @transform_7(%arg0: i32) -> (i32, i32) {
    %c0_i32 = arith.constant 0 : i32
    %c0_i32_0 = arith.constant 0 : i32
    %c0_i32_1 = arith.constant 0 : i32
    return %c0_i32, %c0_i32_0 : i32, i32
  }
  func.func @transform_8(%arg0: i32) -> (i32, i32) {
    %c0_i32 = arith.constant 0 : i32
    %c0_i32_0 = arith.constant 0 : i32
    %c0_i32_1 = arith.constant 0 : i32
    return %c0_i32, %c0_i32_0 : i32, i32
  }
  func.func @transform_9(%arg0: i32) -> (i32, i32) {
    %c0_i32 = arith.constant 0 : i32
    %c0_i32_0 = arith.constant 0 : i32
    %c0_i32_1 = arith.constant 0 : i32
    return %c0_i32, %c0_i32_0 : i32, i32
  }
  func.func @transform_10(%arg0: i32) -> (i32, i32) {
    %c0_i32 = arith.constant 0 : i32
    %c0_i32_0 = arith.constant 0 : i32
    %c0_i32_1 = arith.constant 0 : i32
    return %c0_i32, %c0_i32_0 : i32, i32
  }
  func.func @transform_11(%arg0: i32) -> (i32, i32) {
    %c0_i32 = arith.constant 0 : i32
    %c0_i32_0 = arith.constant 0 : i32
    return %arg0, %c0_i32 : i32, i32
  }
}

</mosaic_0001>

<bundles_post_ra>
// kernel: forward.1
= control target key start
LH: loop header
LB: loop body
LE: loop exit
PB: predicated region body
PF: predicated region fallthrough
CT: control target
= control target key end

     0   :  { %s2313_s17 = smov 0   ;;  %s3026_s0 = inlined_call_operand.vmem [shape: f32[256,128], index: 0, kind: input, shape index: {}]   ;;  %s3027_s1 = inlined_call_operand.vmem [shape: f32[128,128], index: 1, kind: input, shape index: {}]   ;;  %s3028_s2 = inlined_call_operand.vmem [shape: f32[1,128], index: 2, kind: input, shape index: {}]   ;;  %s3029_s3 = inlined_call_operand.vmem [shape: f32[1,128], index: 3, kind: input, shape index: {}]   ;;  %s3030_s4 = inlined_call_operand.vmem [shape: f32[1,128], index: 4, kind: input, shape index: {}]   ;;  %s3031_s5 = inlined_call_operand.vmem [shape: f32[128,128], index: 5, kind: input, shape index: {}]   ;;  %s3032_s6 = inlined_call_operand.vmem [shape: f32[1,128], index: 6, kind: input, shape index: {}]   ;;  %s3033_s7 = inlined_call_operand.vmem [shape: f32[128,128], index: 7, kind: input, shape index: {}]   ;;  %s3034_s8 = inlined_call_operand.vmem [shape: f32[1,128], index: 8, kind: input, shape index: {}]   ;;  %s3035_s9 = inlined_call_operand.vmem [shape: f32[128,128], index: 9, kind: input, shape index: {}]   ;;  %s3036_s10 = inlined_call_operand.vmem [shape: f32[1,128], index: 10, kind: input, shape index: {}]   ;;  %s3037_s11 = inlined_call_operand.vmem [shape: f32[256,128], index: 11, kind: output, shape index: {}]  }
   0x1 LB: > { %s1676_s18 = sadd.s32 4294967295, %s2251_s17   ;;  %p1680_p0 = scmp.ge.s32.totalorder %s2251_s17, 1  ;;  %s2251_s17 = sphi %s2313_s17, %s21_s17  }
   0x2   : > { %p338_p1 = scmp.lt.s32.totalorder %s2251_s17, 3 }
   0x4   : > { %p339_p2 = pnand %p1680_p0, %p338_p1 }
   0x5   : > { %v406_v0 = vld [vmem:[%s3027_s1] sm:$0xff] (!%p339_p2)  ;;  %v407_v1 = vld [vmem:[%s3027_s1 + $0x8] sm:$0xff] (!%p339_p2)  ;;  %v408_v2 = vld [vmem:[%s3027_s1 + $0x10] sm:$0xff] (!%p339_p2)  ;;  %s1681_s25 = sshll.u32 (!%p339_p2), %s1676_s18, 4 }
   0x6   : > { %342 = sbr.rel (%p339_p2) target bundleno = 1303 (0x517), region = 64  ;;  %v2045_v3 = vpack.c.bf16 (!%p339_p2), %v407_v1, %v406_v0  ;;  %v409_v4 = vld [vmem:[%s3027_s1 + $0x18] sm:$0xff] (!%p339_p2)  ;;  %p379_p3 = scmp.lt.s32.totalorder (!%p339_p2), %s1681_s25, 31  ;;  %v410_v6 = vld [vmem:[%s3027_s1 + $0x20] sm:$0xff] (!%p339_p2)  ;;  %v411_v7 = vld [vmem:[%s3027_s1 + $0x28] sm:$0xff] (!%p339_p2) }
   0x7   : > { %v2049_v5 = vpack.c.bf16 (!%p339_p2), %v409_v4, %v408_v2  ;;  %v2053_v8 = vpack.c.bf16 (!%p339_p2), %v411_v7, %v410_v6  ;;  %v412_v9 = vld [vmem:[%s3027_s1 + $0x30] sm:$0xff] (!%p339_p2)  ;;  %v413_v10 = vld [vmem:[%s3027_s1 + $0x38] sm:$0xff] (!%p339_p2)  ;;  %v414_v13 = vld [vmem:[%s3027_s1 + $0x40] sm:$0xff] (!%p339_p2) }
   0x8   : > { %2046 = vmatprep.subr.bf16.mxu0 (!%p339_p2), %v2045_v3  ;;  %v2057_v12 = vpack.c.bf16 (!%p339_p2), %v413_v10, %v412_v9  ;;  %v415_v14 = vld [vmem:[%s3027_s1 + $0x48] sm:$0xff] (!%p339_p2)  ;;  %v416_v16 = vld [vmem:[%s3027_s1 + $0x50] sm:$0xff] (!%p339_p2)  ;;  %v417_v17 = vld [vmem:[%s3027_s1 + $0x58] sm:$0xff] (!%p339_p2) }
   0x9   : > { %2048 = vmatpush3.bf16.msra.mxu0 (!%p339_p2), %v2045_v3  ;;  %v2061_v15 = vpack.c.bf16 (!%p339_p2), %v415_v14, %v414_v13  ;;  %v2065_v18 = vpack.c.bf16 (!%p339_p2), %v417_v17, %v416_v16  ;;  %v418_v19 = vld [vmem:[%s3027_s1 + $0x60] sm:$0xff] (!%p339_p2)  ;;  %v419_v20 = vld [vmem:[%s3027_s1 + $0x68] sm:$0xff] (!%p339_p2)  ;;  %v420_v22 = vld [vmem:[%s3027_s1 + $0x70] sm:$0xff] (!%p339_p2) }
   0xa   : > { %2050 = vmatprep.subr.bf16.mxu0 (!%p339_p2), %v2049_v5  ;;  %v2069_v21 = vpack.c.bf16 (!%p339_p2), %v419_v20, %v418_v19  ;;  %v421_v23 = vld [vmem:[%s3027_s1 + $0x78] sm:$0xff] (!%p339_p2)  ;;  %v2398_v40 = vld [vmem:[%s3028_s2] ss:$0 sm:$0xff] (!%p339_p2)  ;;  %v845_v57 = vld [vmem:[%s3031_s5 + $0x8] sm:$0xff] (!%p339_p2) }
   0xb   : > { %v2073_v24 = vpack.c.bf16 (!%p339_p2), %v421_v23, %v420_v22  ;;  %v844_v56 = vld [vmem:[%s3031_s5] sm:$0xff] (!%p339_p2)  ;;  %v846_v0 = vld [vmem:[%s3031_s5 + $0x10] sm:$0xff] (!%p339_p2)  ;;  %v847_v1 = vld [vmem:[%s3031_s5 + $0x18] sm:$0xff] (!%p339_p2) }
   0xc   : > { %v2077_v60 = vpack.c.bf16 (!%p339_p2), %v845_v57, %v844_v56  ;;  %v2081_v3 = vpack.c.bf16 (!%p339_p2), %v847_v1, %v846_v0  ;;  %v848_v6 = vld [vmem:[%s3031_s5 + $0x20] sm:$0xff] (!%p339_p2)  ;;  %v849_v7 = vld [vmem:[%s3031_s5 + $0x28] sm:$0xff] (!%p339_p2)  ;;  %v851_v16 = vld [vmem:[%s3031_s5 + $0x38] sm:$0xff] (!%p339_p2) }
   0xd   : > { %s3039_s25 = smov (!%p379_p3, %s1681_s25), 31  ;;  %2052 = vmatpush3.bf16.msra.mxu0 %v2049_v5  ;;  %v2085_v10 = vpack.c.bf16 %v849_v7, %v848_v6  ;;  %v852_v22 = vld [vmem:[%s3031_s5 + $0x40] sm:$0xff]  ;;  %v853_v23 = vld [vmem:[%s3031_s5 + $0x48] sm:$0xff]  ;;  %v1031_v57 = vld [vmem:[%s3033_s7 + $0x18] sm:$0xff] }
   0xe   : > { %s1682_s13 = sshll.u32 %s3039_s25, 3  ;;  %2054 = vmatprep.subr.bf16.mxu0 %v2053_v8  ;;  %2078 = vmatprep.subr.bf16.mxu1 %v2077_v60  ;;  %v1034_v0 = vld [vmem:[%s3033_s7 + $0x30] sm:$0xff]  ;;  %v1035_v1 = vld [vmem:[%s3033_s7 + $0x38] sm:$0xff] }
   0xf   : > { %s2353_s21 = scalar_lea.vmem %s3026_s0, %s1682_s13  ;;  %2080 = vmatpush3.bf16.msra.mxu1 %v2077_v60  ;;  %v1032_v60 = vld [vmem:[%s3033_s7 + $0x20] sm:$0xff]  ;;  %v1038_v6 = vld [vmem:[%s3033_s7 + $0x50] sm:$0xff]  ;;  %v1039_v7 = vld [vmem:[%s3033_s7 + $0x58] sm:$0xff]  ;;  %s3005_s20 = scalar_lea.vmem %s3037_s11, %s1682_s13 }
  0x10   : > { %v390_v11 = vld [vmem:[%s2353_s21] sm:$0xff]  ;;  %v391_v25 = vld [vmem:[%s2353_s21 + $0x8] sm:$0xff]  ;;  %v392_v26 = vld [vmem:[%s2353_s21 + $0x10] sm:$0xff]  ;;  %2082 = vmatprep.subr.bf16.mxu1 %v2081_v3 }
  0x11   : > { %1853 = vmatprep.mubr.f32.mxu0 %v390_v11  ;;  %2056 = vmatpush3.bf16.msra.mxu0 %v2053_v8  ;;  %v393_v27 = vld [vmem:[%s2353_s21 + $0x18] sm:$0xff]  ;;  %v394_v28 = vld [vmem:[%s2353_s21 + $0x20] sm:$0xff]  ;;  %v395_v29 = vld [vmem:[%s2353_s21 + $0x28] sm:$0xff] }
  0x12   : > { %2058 = vmatprep.subr.bf16.mxu0 %v2057_v12  ;;  %v396_v30 = vld [vmem:[%s2353_s21 + $0x30] sm:$0xff]  ;;  %v397_v31 = vld [vmem:[%s2353_s21 + $0x38] sm:$0xff]  ;;  %v398_v32 = vld [vmem:[%s2353_s21 + $0x40] sm:$0xff] }
  0x13   : > { %v399_v33 = vld [vmem:[%s2353_s21 + $0x48] sm:$0xff]  ;;  %v400_v34 = vld [vmem:[%s2353_s21 + $0x50] sm:$0xff]  ;;  %v401_v35 = vld [vmem:[%s2353_s21 + $0x58] sm:$0xff]  ;;  %2084 = vmatpush3.bf16.msra.mxu1 %v2081_v3 }
  0x14   : > { %v402_v36 = vld [vmem:[%s2353_s21 + $0x60] sm:$0xff]  ;;  %v403_v37 = vld [vmem:[%s2353_s21 + $0x68] sm:$0xff]  ;;  %v404_v38 = vld [vmem:[%s2353_s21 + $0x70] sm:$0xff]  ;;  %2086 = vmatprep.subr.bf16.mxu1 %v2085_v10 }
  0x15   : > { %2060 = vmatpush3.bf16.msra.mxu0 %v2057_v12  ;;  %v405_v39 = vld [vmem:[%s2353_s21 + $0x78] sm:$0xff]  ;;  %v1036_v3 = vld [vmem:[%s3033_s7 + $0x40] sm:$0xff] }
  0x16   : > { %2062 = vmatprep.subr.bf16.mxu0 %v2061_v15 }
  0x17   : > { %2088 = vmatpush3.bf16.msra.mxu1 %v2085_v10  ;;  %v1040_v10 = vld [vmem:[%s3033_s7 + $0x60] sm:$0xff] }
  0x19   : > { %2064 = vmatpush3.bf16.msra.mxu0 %v2061_v15  ;;  %v850_v15 = vld [vmem:[%s3031_s5 + $0x30] sm:$0xff] }
  0x1a   : > { %2066 = vmatprep.subr.bf16.mxu0 %v2065_v18 }
  0x1d   : > { %2068 = vmatpush3.bf16.msra.mxu0 %v2065_v18  ;;  %v2089_v18 = vpack.c.bf16 %v851_v16, %v850_v15 }
  0x1e   : > { %2070 = vmatprep.subr.bf16.mxu0 %v2069_v21 }
  0x1f   : > { %2090 = vmatprep.subr.bf16.mxu1 %v2089_v18 }
  0x20   : > { %2092 = vmatpush3.bf16.msra.mxu1 %v2089_v18 }
  0x21   : > { %2072 = vmatpush3.bf16.msra.mxu0 %v2069_v21 }
  0x22   : > { %2074 = vmatprep.subr.bf16.mxu0 %v2073_v24 }
  0x25   : > { %2076 = vmatpush3.bf16.msra.mxu0 %v2073_v24  ;;  %v2093_v24 = vpack.c.bf16 %v853_v23, %v852_v22 }
  0x27   : > { %2094 = vmatprep.subr.bf16.mxu1 %v2093_v24 }
  0x28   : > { %1854 = vmatmul.mubr.f32.vlgmr.msra.gmra.mrb[0].mxu0 %v391_v25  ;;  %2096 = vmatpush3.bf16.msra.mxu1 %v2093_v24 }
  0x29   : > { %1856 = vmatprep.mubr.f32.mxu0 %v392_v26 }
  0x2c   : > { %1857 = vmatmul.mubr.f32.gmra.mrb[2].mxu0 %v393_v27  ;;  %v854_v27 = vld [vmem:[%s3031_s5 + $0x50] sm:$0xff] }
  0x2d   : > { %1859 = vmatprep.mubr.f32.mxu0 %v394_v28  ;;  %v855_v28 = vld [vmem:[%s3031_s5 + $0x58] sm:$0xff] }
  0x30   : > { %1860 = vmatmul.mubr.f32.gmra.mrb[4].mxu0 %v395_v29  ;;  %v2097_v29 = vpack.c.bf16 %v855_v28, %v854_v27 }
  0x31   : > { %1862 = vmatprep.mubr.f32.mxu0 %v396_v30 }
  0x32   : > { %2098 = vmatprep.subr.bf16.mxu1 %v2097_v29 }
  0x33   : > { %2100 = vmatpush3.bf16.msra.mxu1 %v2097_v29 }
  0x34   : > { %1863 = vmatmul.mubr.f32.gmra.mrb[6].mxu0 %v397_v31 }
  0x35   : > { %1865 = vmatprep.mubr.f32.mxu0 %v398_v32  ;;  %v856_v32 = vld [vmem:[%s3031_s5 + $0x60] sm:$0xff] }
  0x38   : > { %1866 = vmatmul.mubr.f32.gmra.mrb[8].mxu0 %v399_v33  ;;  %v857_v33 = vld [vmem:[%s3031_s5 + $0x68] sm:$0xff] }
  0x39   : > { %1868 = vmatprep.mubr.f32.mxu0 %v400_v34  ;;  %v2101_v34 = vpack.c.bf16 %v857_v33, %v856_v32 }
  0x3b   : > { %2102 = vmatprep.subr.bf16.mxu1 %v2101_v34 }
  0x3c   : > { %1869 = vmatmul.mubr.f32.gmra.mrb[10].mxu0 %v401_v35  ;;  %2104 = vmatpush3.bf16.msra.mxu1 %v2101_v34 }
  0x3d   : > { %1871 = vmatprep.mubr.f32.mxu0 %v402_v36 }
  0x40   : > { %1872 = vmatmul.mubr.f32.gmra.mrb[12].mxu0 %v403_v37  ;;  %v858_v37 = vld [vmem:[%s3031_s5 + $0x70] sm:$0xff] }
  0x41   : > { %1874 = vmatprep.mubr.f32.mxu0 %v404_v38  ;;  %v859_v38 = vld [vmem:[%s3031_s5 + $0x78] sm:$0xff] }
  0x44   : > { %1875 = vmatmul.mubr.f32.gmra.mrb[14].mxu0 %v405_v39  ;;  %v2105_v39 = vpack.c.bf16 %v859_v38, %v858_v37 }
  0x46   : > { %2106 = vmatprep.subr.bf16.mxu1 %v2105_v39 }
  0x47   : > { %2108 = vmatpush3.bf16.msra.mxu1 %v2105_v39 }
  0xfb   : > { %v1855_v41 = vpop.f32.mrb[0].mxu0 }
  0xfc   : > { %v2401_v42 = vadd.f32 %v1855_v41, %v2398_v40  ;;  %v495_v43 = vpop.f32.mrb[1].mxu0 }
  0xfd   : > { %v2404_v44 = vadd.f32 %v2398_v40, %v495_v43 }
  0xfe   : > { %576 = vadd.xlane.f32.xlu0 %v2401_v42  ;;  %v623_v45 = vmul.f32 %v2401_v42, %v2401_v42 }
  0xff   : > { %v1858_v46 = vpop.f32.mrb[2].mxu0  ;;  %v622_v49 = vmul.f32 %v2404_v44, %v2404_v44 }
 0x100   : > { %640 = vadd.xlane.f32.xlu1 %v623_v45  ;;  %v505_v47 = vpop.f32.mrb[3].mxu0  ;;  %v2416_v51 = vadd.f32 %v1858_v46, %v2398_v40 }
 0x101   : > { %v2411_v48 = vadd.f32 %v2398_v40, %v505_v47 }
 0x102   : > { %574 = vadd.xlane.f32.xlu0 %v2404_v44  ;;  %v625_v59 = vmul.f32 %v2416_v51, %v2416_v51 }
 0x103   : > { %v1861_v50 = vpop.f32.mrb[4].mxu0  ;;  %v624_v53 = vmul.f32 %v2411_v48, %v2411_v48 }
 0x104   : > { %638 = vadd.xlane.f32.xlu1 %v622_v49  ;;  %v515_v52 = vpop.f32.mrb[5].mxu0  ;;  %v2434_v62 = vadd.f32 %v1861_v50, %v2398_v40 }
 0x105   : > { %v2429_v58 = vadd.f32 %v2398_v40, %v515_v52 }
 0x106   : > { %578 = vadd.xlane.f32.xlu0 %v2411_v48  ;;  %v627_v9 = vmul.f32 %v2434_v62, %v2434_v62 }
 0x107   : > { %v1864_v54 = vpop.f32.mrb[6].mxu0  ;;  %v626_v2 = vmul.f32 %v2429_v58, %v2429_v58 }
 0x108   : > { %580 = vadd.xlane.f32.xlu1 %v2416_v51  ;;  %v525_v55 = vpop.f32.mrb[7].mxu0  ;;  %v2458_v12 = vadd.f32 %v1864_v54, %v2398_v40  ;;  %v1028_v54 = vld [vmem:[%s3033_s7] sm:$0xff] }
 0x109   : > { %v2453_v8 = vadd.f32 %v2398_v40, %v525_v55  ;;  %v1030_v55 = vld [vmem:[%s3033_s7 + $0x10] sm:$0xff] }
 0x10a   : > { %642 = vadd.xlane.f32.xlu0 %v624_v53  ;;  %v629_v21 = vmul.f32 %v2458_v12, %v2458_v12 }
 0x10b   : > { %v1867_v61 = vpop.f32.mrb[8].mxu0  ;;  %v628_v14 = vmul.f32 %v2453_v8, %v2453_v8 }
 0x10c   : > { %644 = vadd.xlane.f32.xlu1 %v625_v59  ;;  %v535_v63 = vpop.f32.mrb[9].mxu0  ;;  %v2482_v25 = vadd.f32 %v1867_v61, %v2398_v40  ;;  %v2113_v59 = vpack.c.bf16 %v1031_v57, %v1030_v55  ;;  %v1033_v61 = vld [vmem:[%s3033_s7 + $0x28] sm:$0xff] }
 0x10d   : > { %v2471_v20 = vadd.f32 %v2398_v40, %v535_v63  ;;  %v2117_v63 = vpack.c.bf16 %v1033_v61, %v1032_v60 }
 0x10e   : > { %582 = vadd.xlane.f32.xlu0 %v2429_v58  ;;  %v631_v31 = vmul.f32 %v2482_v25, %v2482_v25 }
 0x10f   : > { %v1870_v4 = vpop.f32.mrb[10].mxu0  ;;  %v630_v26 = vmul.f32 %v2471_v20, %v2471_v20 }
 0x110   : > { %584 = vadd.xlane.f32.xlu1 %v2434_v62  ;;  %v545_v5 = vpop.f32.mrb[11].mxu0  ;;  %v2506_v35 = vadd.f32 %v1870_v4, %v2398_v40  ;;  %v1037_v4 = vld [vmem:[%s3033_s7 + $0x48] sm:$0xff] }
 0x111   : > { %v2495_v30 = vadd.f32 %v2398_v40, %v545_v5  ;;  %v2125_v5 = vpack.c.bf16 %v1037_v4, %v1036_v3 }
 0x112   : > { %646 = vadd.xlane.f32.xlu0 %v626_v2  ;;  %v633_v43 = vmul.f32 %v2506_v35, %v2506_v35  ;;  %v2121_v2 = vpack.c.bf16 %v1035_v1, %v1034_v0 }
 0x113   : > { %v1873_v11 = vpop.f32.mrb[12].mxu0  ;;  %v632_v36 = vmul.f32 %v2495_v30, %v2495_v30 }
 0x114   : > { %648 = vadd.xlane.f32.xlu1 %v627_v9  ;;  %v555_v13 = vpop.f32.mrb[13].mxu0  ;;  %v2524_v45 = vadd.f32 %v1873_v11, %v2398_v40  ;;  %v2129_v9 = vpack.c.bf16 %v1039_v7, %v1038_v6  ;;  %v1041_v11 = vld [vmem:[%s3033_s7 + $0x68] sm:$0xff] }
 0x115   : > { %v2519_v41 = vadd.f32 %v2398_v40, %v555_v13  ;;  %v2133_v13 = vpack.c.bf16 %v1041_v11, %v1040_v10  ;;  %v2606_v11 = vld [vmem:[%s3029_s3] ss:$0 sm:$0xff] }
 0x116   : > { %586 = vadd.xlane.f32.xlu0 %v2453_v8  ;;  %v635_v49 = vmul.f32 %v2524_v45, %v2524_v45 }
 0x117   : > { %v1876_v17 = vpop.f32.mrb[14].mxu0  ;;  %v634_v46 = vmul.f32 %v2519_v41, %v2519_v41 }
 0x118   : > { %588 = vadd.xlane.f32.xlu1 %v2458_v12  ;;  %v565_v19 = vpop.f32.mrb[15].mxu0  ;;  %v2536_v50 = vadd.f32 %v1876_v17, %v2398_v40 }
 0x119   : > { %v2531_v47 = vadd.f32 %v2398_v40, %v565_v19  ;;  %v1029_v40 = vld [vmem:[%s3033_s7 + $0x8] sm:$0xff] }
 0x11a   : > { %650 = vadd.xlane.f32.xlu0 %v628_v14  ;;  %v637_v53 = vmul.f32 %v2536_v50, %v2536_v50  ;;  %v2109_v56 = vpack.c.bf16 %v1029_v40, %v1028_v54 }
 0x11b   : > { %v636_v52 = vmul.f32 %v2531_v47, %v2531_v47 }
 0x11c   : > { %652 = vadd.xlane.f32.xlu1 %v629_v21  ;;  %2110 = vmatprep.subr.bf16.mxu0 %v2109_v56 }
 0x11d   : > { %2112 = vmatpush3.bf16.msra.mxu0 %v2109_v56 }
 0x11e   : > { %590 = vadd.xlane.f32.xlu0 %v2471_v20  ;;  %2114 = vmatprep.subr.bf16.mxu0 %v2113_v59 }
 0x120   : > { %592 = vadd.xlane.f32.xlu1 %v2482_v25 }
 0x121   : > { %2116 = vmatpush3.bf16.msra.mxu0 %v2113_v59 }
 0x122   : > { %654 = vadd.xlane.f32.xlu0 %v630_v26  ;;  %2118 = vmatprep.subr.bf16.mxu0 %v2117_v63 }
 0x124   : > { %656 = vadd.xlane.f32.xlu1 %v631_v31 }
 0x125   : > { %2120 = vmatpush3.bf16.msra.mxu0 %v2117_v63 }
 0x126   : > { %594 = vadd.xlane.f32.xlu0 %v2495_v30  ;;  %2122 = vmatprep.subr.bf16.mxu0 %v2121_v2 }
 0x128   : > { %596 = vadd.xlane.f32.xlu1 %v2506_v35 }
 0x129   : > { %2124 = vmatpush3.bf16.msra.mxu0 %v2121_v2 }
 0x12a   : > { %658 = vadd.xlane.f32.xlu0 %v632_v36  ;;  %2126 = vmatprep.subr.bf16.mxu0 %v2125_v5 }
 0x12c   : > { %660 = vadd.xlane.f32.xlu1 %v633_v43 }
 0x12d   : > { %2128 = vmatpush3.bf16.msra.mxu0 %v2125_v5 }
 0x12e   : > { %598 = vadd.xlane.f32.xlu0 %v2519_v41  ;;  %2130 = vmatprep.subr.bf16.mxu0 %v2129_v9 }
 0x130   : > { %600 = vadd.xlane.f32.xlu1 %v2524_v45 }
 0x131   : > { %2132 = vmatpush3.bf16.msra.mxu0 %v2129_v9 }
 0x132   : > { %662 = vadd.xlane.f32.xlu0 %v634_v46  ;;  %2134 = vmatprep.subr.bf16.mxu0 %v2133_v13 }
 0x134   : > { %664 = vadd.xlane.f32.xlu1 %v635_v49 }
 0x135   : > { %2136 = vmatpush3.bf16.msra.mxu0 %v2133_v13 }
 0x136   : > { %602 = vadd.xlane.f32.xlu0 %v2531_v47 }
 0x138   : > { %604 = vadd.xlane.f32.xlu1 %v2536_v50 }
 0x13a   : > { %666 = vadd.xlane.f32.xlu0 %v636_v52 }
 0x13c   : > { %668 = vadd.xlane.f32.xlu1 %v637_v53 }
 0x18b   : > { %v577_v14 = vpop.xlane.xlu0 %576 }
 0x18c   : > { %v607_v15 = vmul.f32 0.03125, %v577_v14 }
 0x18d   : > { %v641_v16 = vpop.xlane.xlu1 %640 }
 0x18e   : > { %v687_v17 = vmul.f32 %v607_v15, %v607_v15  ;;  %v671_v18 = vmul.f32 0.03125, %v641_v16  ;;  %v735_v63 = vsub.f32 %v2401_v42, %v607_v15 }
 0x18f   : > { %v575_v19 = vpop.xlane.xlu0 %574 }
 0x190   : > { %v703_v21 = vsub.f32 %v671_v18, %v687_v17  ;;  %v606_v22 = vmul.f32 0.03125, %v575_v19 }
 0x191   : > { %v639_v23 = vpop.xlane.xlu1 %638 }
 0x192   : > { %v719_v24 = vmax.f32 %v703_v21, 0.0  ;;  %v686_v26 = vmul.f32 %v606_v22, %v606_v22  ;;  %v670_v27 = vmul.f32 0.03125, %v639_v23  ;;  %v734_v42 = vsub.f32 %v2404_v44, %v606_v22 }
 0x193   : > { %v579_v28 = vpop.xlane.xlu0 %578 }
 0x194   : > { %v751_v29 = vadd.f32 1e-05, %v719_v24  ;;  %v702_v31 = vsub.f32 %v670_v27, %v686_v26  ;;  %v2586_v32 = vmul.f32 0.03125, %v579_v28  ;;  %v2617_v27 = vld [vmem:[%s3030_s4] ss:$0 sm:$0xff] }
 0x195   : > { %v581_v33 = vpop.xlane.xlu1 %580 }
 0x196   : > { %2181 = vrsqrt.f32 %v751_v29  ;;  %v718_v34 = vmax.f32 %v702_v31, 0.0  ;;  %v688_v36 = vmul.f32 %v2586_v32, %v2586_v32  ;;  %v2590_v37 = vmul.f32 0.03125, %v581_v33 }
 0x197   : > { %v643_v38 = vpop.xlane.xlu0 %642  ;;  %v736_v33 = vsub.f32 %v2411_v48, %v2586_v32 }
 0x198   : > { %v750_v39 = vadd.f32 1e-05, %v718_v34  ;;  %v672_v43 = vmul.f32 0.03125, %v643_v38  ;;  %v689_v49 = vmul.f32 %v2590_v37, %v2590_v37 }
 0x199   : > { %v645_v46 = vpop.xlane.xlu1 %644 }
 0x19a   : > { %2183 = vrsqrt.f32 %v750_v39  ;;  %v704_v52 = vsub.f32 %v672_v43, %v688_v36  ;;  %v673_v53 = vmul.f32 0.03125, %v645_v46 }
 0x19b   : > { %v583_v54 = vpop.xlane.xlu0 %582 }
 0x19c   : > { %v720_v40 = vmax.f32 %v704_v52, 0.0  ;;  %v705_v55 = vsub.f32 %v673_v53, %v689_v49  ;;  %v2594_v56 = vmul.f32 0.03125, %v583_v54  ;;  %v737_v52 = vsub.f32 %v2416_v51, %v2590_v37 }
 0x19d   : > { %v585_v57 = vpop.xlane.xlu1 %584 }
 0x19e   : > { %v752_v59 = vadd.f32 1e-05, %v720_v40  ;;  %v721_v60 = vmax.f32 %v705_v55, 0.0  ;;  %v690_v61 = vmul.f32 %v2594_v56, %v2594_v56  ;;  %v2599_v0 = vmul.f32 0.03125, %v585_v57 }
 0x19f   : > { %v647_v1 = vpop.xlane.xlu0 %646 }
 0x1a0   : > { %v2182_v2 = vpop.eup %2181  ;;  %2185 = vrsqrt.f32 %v752_v59  ;;  %v753_v3 = vadd.f32 1e-05, %v721_v60  ;;  %v674_v4 = vmul.f32 0.03125, %v647_v1  ;;  %v691_v7 = vmul.f32 %v2599_v0, %v2599_v0 }
 0x1a1   : > { %v649_v5 = vpop.xlane.xlu1 %648  ;;  %v783_v6 = vmul.f32 %v2182_v2, %v735_v63 }
 0x1a2   : > { %2187 = vrsqrt.f32 %v753_v3  ;;  %v706_v9 = vsub.f32 %v674_v4, %v690_v61  ;;  %v675_v10 = vmul.f32 0.03125, %v649_v5 }
 0x1a3   : > { %v587_v13 = vpop.xlane.xlu0 %586  ;;  %v806_v21 = vmul.f32 %v2606_v11, %v783_v6  ;;  %v738_v6 = vsub.f32 %v2429_v58, %v2594_v56 }
 0x1a4   : > { %v2184_v14 = vpop.eup %2183  ;;  %v722_v15 = vmax.f32 %v706_v9, 0.0  ;;  %v707_v16 = vsub.f32 %v675_v10, %v691_v7  ;;  %v2609_v17 = vmul.f32 0.03125, %v587_v13 }
 0x1a5   : > { %v589_v18 = vpop.xlane.xlu1 %588  ;;  %v782_v19 = vmul.f32 %v2184_v14, %v734_v42  ;;  %v2628_v38 = vadd.f32 %v2617_v27, %v806_v21 }
 0x1a6   : > { %v754_v23 = vadd.f32 1e-05, %v722_v15  ;;  %v723_v24 = vmax.f32 %v707_v16, 0.0  ;;  %v692_v26 = vmul.f32 %v2609_v17, %v2609_v17  ;;  %v2619_v44 = vmul.f32 0.03125, %v589_v18 }
 0x1a7   : > { %v651_v22 = vpop.xlane.xlu0 %650  ;;  %v805_v28 = vmul.f32 %v2606_v11, %v782_v19  ;;  %v739_v15 = vsub.f32 %v2434_v62, %v2599_v0 }
 0x1a8   : > { %2189 = vrsqrt.f32 %v754_v23  ;;  %v755_v29 = vadd.f32 1e-05, %v723_v24  ;;  %v676_v31 = vmul.f32 0.03125, %v651_v22  ;;  %v693_v43 = vmul.f32 %v2619_v44, %v2619_v44 }
 0x1a9   : > { %v653_v34 = vpop.xlane.xlu1 %652  ;;  %v2625_v36 = vadd.f32 %v2617_v27, %v805_v28 }
 0x1aa   : > { %v2186_v39 = vpop.eup %2185  ;;  %2191 = vrsqrt.f32 %v755_v29  ;;  %v708_v46 = vsub.f32 %v676_v31, %v692_v26  ;;  %v677_v49 = vmul.f32 0.03125, %v653_v34 }
 0x1ab   : > { %v591_v53 = vpop.xlane.xlu0 %590  ;;  %1909 = vmatprep.mubr.f32.mxu1 %v2625_v36  ;;  %v784_v48 = vmul.f32 %v2186_v39, %v736_v33 }
 0x1ac   : > { %v2188_v32 = vpop.eup %2187  ;;  %v724_v54 = vmax.f32 %v708_v46, 0.0  ;;  %v709_v40 = vsub.f32 %v677_v49, %v693_v43  ;;  %v2635_v55 = vmul.f32 0.03125, %v591_v53  ;;  %1910 = vmatmul.mubr.f32.vlgmr.msra.gmra.mrb[0].mxu1 %v2628_v38  ;;  %v740_v43 = vsub.f32 %v2453_v8, %v2609_v17 }
 0x1ad   : > { %v593_v57 = vpop.xlane.xlu1 %592  ;;  %v807_v59 = vmul.f32 %v2606_v11, %v784_v48  ;;  %v785_v60 = vmul.f32 %v2188_v32, %v737_v52 }
 0x1ae   : > { %v756_v61 = vadd.f32 1e-05, %v724_v54  ;;  %v725_v63 = vmax.f32 %v709_v40, 0.0  ;;  %v694_v51 = vmul.f32 %v2635_v55, %v2635_v55  ;;  %v2641_v37 = vmul.f32 0.03125, %v593_v57 }
 0x1af   : > { %v655_v1 = vpop.xlane.xlu0 %654  ;;  %v2644_v2 = vadd.f32 %v2617_v27, %v807_v59  ;;  %v808_v3 = vmul.f32 %v2606_v11, %v785_v60  ;;  %v741_v54 = vsub.f32 %v2458_v12, %v2619_v44 }
 0x1b0   : > { %2193 = vrsqrt.f32 %v756_v61  ;;  %v757_v4 = vadd.f32 1e-05, %v725_v63  ;;  %v678_v5 = vmul.f32 0.03125, %v655_v1  ;;  %v695_v42 = vmul.f32 %v2641_v37, %v2641_v37 }
 0x1b1   : > { %1912 = vmatprep.mubr.f32.mxu1 %v2644_v2  ;;  %v657_v7 = vpop.xlane.xlu1 %656  ;;  %v2651_v9 = vadd.f32 %v2617_v27, %v808_v3 }
 0x1b2   : > { %v2190_v10 = vpop.eup %2189  ;;  %2195 = vrsqrt.f32 %v757_v4  ;;  %v710_v13 = vsub.f32 %v678_v5, %v694_v51  ;;  %v679_v14 = vmul.f32 0.03125, %v657_v7 }
 0x1b3   : > { %v595_v16 = vpop.xlane.xlu0 %594  ;;  %1913 = vmatmul.mubr.f32.gmra.mrb[2].mxu1 %v2651_v9  ;;  %v786_v58 = vmul.f32 %v2190_v10, %v738_v6 }
 0x1b4   : > { %v2192_v56 = vpop.eup %2191  ;;  %v726_v18 = vmax.f32 %v710_v13, 0.0  ;;  %v711_v19 = vsub.f32 %v679_v14, %v695_v42  ;;  %v2658_v21 = vmul.f32 0.03125, %v595_v16  ;;  %v742_v42 = vsub.f32 %v2471_v20, %v2635_v55 }
 0x1b5   : > { %v597_v23 = vpop.xlane.xlu1 %596  ;;  %v809_v24 = vmul.f32 %v2606_v11, %v786_v58  ;;  %v787_v26 = vmul.f32 %v2192_v56, %v739_v15 }
 0x1b6   : > { %v758_v22 = vadd.f32 1e-05, %v726_v18  ;;  %v727_v28 = vmax.f32 %v711_v19, 0.0  ;;  %v696_v29 = vmul.f32 %v2658_v21, %v2658_v21  ;;  %v2663_v31 = vmul.f32 0.03125, %v597_v23 }
 0x1b7   : > { %v659_v62 = vpop.xlane.xlu0 %658  ;;  %v2666_v0 = vadd.f32 %v2617_v27, %v809_v24  ;;  %v810_v33 = vmul.f32 %v2606_v11, %v787_v26  ;;  %v743_v18 = vsub.f32 %v2482_v25, %v2641_v37 }
 0x1b8   : > { %2197 = vrsqrt.f32 %v758_v22  ;;  %v759_v34 = vadd.f32 1e-05, %v727_v28  ;;  %v680_v39 = vmul.f32 0.03125, %v659_v62  ;;  %v697_v53 = vmul.f32 %v2663_v31, %v2663_v31 }
 0x1b9   : > { %1915 = vmatprep.mubr.f32.mxu1 %v2666_v0  ;;  %v661_v46 = vpop.xlane.xlu1 %660  ;;  %v2673_v49 = vadd.f32 %v2617_v27, %v810_v33 }
 0x1ba   : > { %v2194_v52 = vpop.eup %2193  ;;  %2199 = vrsqrt.f32 %v759_v34  ;;  %v712_v48 = vsub.f32 %v680_v39, %v696_v29  ;;  %v681_v32 = vmul.f32 0.03125, %v661_v46 }
 0x1bb   : > { %v599_v40 = vpop.xlane.xlu0 %598  ;;  %1916 = vmatmul.mubr.f32.gmra.mrb[4].mxu1 %v2673_v49  ;;  %v788_v8 = vmul.f32 %v2194_v52, %v740_v43 }
 0x1bc   : > { %v2196_v17 = vpop.eup %2195  ;;  %v728_v57 = vmax.f32 %v712_v48, 0.0  ;;  %v713_v59 = vsub.f32 %v681_v32, %v697_v53  ;;  %v2680_v60 = vmul.f32 0.03125, %v599_v40  ;;  %v744_v53 = vsub.f32 %v2495_v30, %v2658_v21 }
 0x1bd   : > { %v601_v61 = vpop.xlane.xlu1 %600  ;;  %v811_v63 = vmul.f32 %v2606_v11, %v788_v8  ;;  %v789_v51 = vmul.f32 %v2196_v17, %v741_v54 }
 0x1be   : > { %v760_v1 = vadd.f32 1e-05, %v728_v57  ;;  %v729_v3 = vmax.f32 %v713_v59, 0.0  ;;  %v698_v4 = vmul.f32 %v2680_v60, %v2680_v60  ;;  %v2685_v5 = vmul.f32 0.03125, %v601_v61 }
 0x1bf   : > { %v663_v12 = vpop.xlane.xlu0 %662  ;;  %v2688_v44 = vadd.f32 %v2617_v27, %v811_v63  ;;  %v812_v6 = vmul.f32 %v2606_v11, %v789_v51  ;;  %v745_v57 = vsub.f32 %v2506_v35, %v2663_v31  ;;  %v746_v35 = vsub.f32 %v2519_v41, %v2680_v60 }
 0x1c0   : > { %2201 = vrsqrt.f32 %v760_v1  ;;  %v761_v7 = vadd.f32 1e-05, %v729_v3  ;;  %v682_v10 = vmul.f32 0.03125, %v663_v12  ;;  %v699_v16 = vmul.f32 %v2685_v5, %v2685_v5 }
 0x1c1   : > { %1918 = vmatprep.mubr.f32.mxu1 %v2688_v44  ;;  %v665_v13 = vpop.xlane.xlu1 %664  ;;  %v2695_v14 = vadd.f32 %v2617_v27, %v812_v6 }
 0x1c2   : > { %v2198_v15 = vpop.eup %2197  ;;  %2203 = vrsqrt.f32 %v761_v7  ;;  %v714_v58 = vsub.f32 %v682_v10, %v698_v4  ;;  %v683_v56 = vmul.f32 0.03125, %v665_v13  ;;  %v747_v10 = vsub.f32 %v2524_v45, %v2685_v5 }
 0x1c3   : > { %v603_v19 = vpop.xlane.xlu0 %602  ;;  %1919 = vmatmul.mubr.f32.gmra.mrb[6].mxu1 %v2695_v14  ;;  %v790_v20 = vmul.f32 %v2198_v15, %v742_v42 }
 0x1c4   : > { %v2200_v55 = vpop.eup %2199  ;;  %v730_v23 = vmax.f32 %v714_v58, 0.0  ;;  %v715_v24 = vsub.f32 %v683_v56, %v699_v16  ;;  %v620_v26 = vmul.f32 0.03125, %v603_v19 }
 0x1c5   : > { %v605_v22 = vpop.xlane.xlu1 %604  ;;  %v813_v28 = vmul.f32 %v2606_v11, %v790_v20  ;;  %v791_v29 = vmul.f32 %v2200_v55, %v743_v18 }
 0x1c6   : > { %v762_v62 = vadd.f32 1e-05, %v730_v23  ;;  %v731_v33 = vmax.f32 %v715_v24, 0.0  ;;  %v700_v34 = vmul.f32 %v620_v26, %v620_v26  ;;  %v621_v39 = vmul.f32 0.03125, %v605_v22 }
 0x1c7   : > { %v667_v43 = vpop.xlane.xlu0 %666  ;;  %v2704_v46 = vadd.f32 %v2617_v27, %v813_v28  ;;  %v814_v25 = vmul.f32 %v2606_v11, %v791_v29  ;;  %v748_v60 = vsub.f32 %v2531_v47, %v620_v26  ;;  %v1043_v26 = vld [vmem:[%s3033_s7 + $0x78] sm:$0xff] }
 0x1c8   : > { %2205 = vrsqrt.f32 %v762_v62  ;;  %v763_v37 = vadd.f32 1e-05, %v731_v33  ;;  %v684_v52 = vmul.f32 0.03125, %v667_v43  ;;  %v701_v40 = vmul.f32 %v621_v39, %v621_v39 }
 0x1c9   : > { %1921 = vmatprep.mubr.f32.mxu1 %v2704_v46  ;;  %v669_v48 = vpop.xlane.xlu1 %668  ;;  %v2711_v32 = vadd.f32 %v2617_v27, %v814_v25  ;;  %v749_v5 = vsub.f32 %v2536_v50, %v621_v39  ;;  %v1042_v50 = vld [vmem:[%s3033_s7 + $0x70] sm:$0xff] }
 0x1ca   : > { %v2202_v54 = vpop.eup %2201  ;;  %2207 = vrsqrt.f32 %v763_v37  ;;  %v716_v8 = vsub.f32 %v684_v52, %v700_v34  ;;  %v685_v17 = vmul.f32 0.03125, %v669_v48  ;;  %v2137_v22 = vpack.c.bf16 %v1043_v26, %v1042_v50 }
 0x1cb   : > { %1922 = vmatmul.mubr.f32.gmra.mrb[8].mxu1 %v2711_v32  ;;  %v792_v59 = vmul.f32 %v2202_v54, %v744_v53 }
 0x1cc   : > { %v2204_v61 = vpop.eup %2203  ;;  %v732_v63 = vmax.f32 %v716_v8, 0.0  ;;  %v717_v30 = vsub.f32 %v685_v17, %v701_v40  ;;  %2138 = vmatprep.subr.bf16.mxu0 %v2137_v22 }
 0x1cd   : > { %v815_v21 = vmul.f32 %v2606_v11, %v792_v59  ;;  %v793_v51 = vmul.f32 %v2204_v61, %v745_v57  ;;  %2140 = vmatpush3.bf16.msra.mxu0 %v2137_v22 }
 0x1ce   : > { %v764_v1 = vadd.f32 1e-05, %v732_v63  ;;  %v733_v3 = vmax.f32 %v717_v30, 0.0 }
 0x1cf   : > { %v2718_v4 = vadd.f32 %v2617_v27, %v815_v21  ;;  %v816_v12 = vmul.f32 %v2606_v11, %v793_v51 }
 0x1d0   : > { %2209 = vrsqrt.f32 %v764_v1  ;;  %v765_v6 = vadd.f32 1e-05, %v733_v3 }
 0x1d1   : > { %1924 = vmatprep.mubr.f32.mxu1 %v2718_v4  ;;  %v2725_v31 = vadd.f32 %v2617_v27, %v816_v12 }
 0x1d2   : > { %v2206_v7 = vpop.eup %2205  ;;  %2211 = vrsqrt.f32 %v765_v6 }
 0x1d3   : > { %1925 = vmatmul.mubr.f32.gmra.mrb[10].mxu1 %v2725_v31  ;;  %v794_v42 = vmul.f32 %v2206_v7, %v746_v35 }
 0x1d4   : > { %v2208_v13 = vpop.eup %2207 }
 0x1d5   : > { %v817_v15 = vmul.f32 %v2606_v11, %v794_v42  ;;  %v795_v16 = vmul.f32 %v2208_v13, %v747_v10 }
 0x1d7   : > { %v2732_v58 = vadd.f32 %v2617_v27, %v817_v15  ;;  %v818_v41 = vmul.f32 %v2606_v11, %v795_v16 }
 0x1d9   : > { %1927 = vmatprep.mubr.f32.mxu1 %v2732_v58  ;;  %v2738_v56 = vadd.f32 %v2617_v27, %v818_v41 }
 0x1da   : > { %v2210_v45 = vpop.eup %2209 }
 0x1db   : > { %1928 = vmatmul.mubr.f32.gmra.mrb[12].mxu1 %v2738_v56  ;;  %v796_v18 = vmul.f32 %v2210_v45, %v748_v60 }
 0x1dc   : > { %v2212_v19 = vpop.eup %2211 }
 0x1dd   : > { %v819_v20 = vmul.f32 %v2606_v11, %v796_v18  ;;  %v797_v55 = vmul.f32 %v2212_v19, %v749_v5 }
 0x1df   : > { %v2744_v23 = vadd.f32 %v2617_v27, %v819_v20  ;;  %v820_v47 = vmul.f32 %v2606_v11, %v797_v55  ;;  %v1688_v11 = vld [vmem:[%s3032_s6] ss:$0 sm:$0xff] }
 0x1e1   : > { %1930 = vmatprep.mubr.f32.mxu1 %v2744_v23  ;;  %v2749_v24 = vadd.f32 %v2617_v27, %v820_v47 }
 0x1e3   : > { %1931 = vmatmul.mubr.f32.gmra.mrb[14].mxu1 %v2749_v24 }
 0x27f   : > { %v1911_v28 = vpop.f32.mrb[0].mxu1 }
 0x280   : > { %v939_v27 = vadd.f32 %v1911_v28, %v1688_v11  ;;  %v933_v29 = vpop.f32.mrb[1].mxu1 }
 0x281   : > { %v934_v62 = vadd.f32 %v1688_v11, %v933_v29  ;;  %v1437_v29 = vld [vmem:[%s3035_s9 + $0x8] sm:$0xff] }
 0x282   : > { %v1013_v34 = vmax.f32 %v939_v27, 0.0  ;;  %v1436_v27 = vld [vmem:[%s3035_s9] sm:$0xff] }
 0x283   : > { %v1012_v33 = vmax.f32 %v934_v62, 0.0  ;;  %v1438_v62 = vld [vmem:[%s3035_s9 + $0x10] sm:$0xff] }
 0x285   : > { %1965 = vmatprep.mubr.f32.mxu0 %v1012_v33  ;;  %v2141_v33 = vpack.c.bf16 %v1437_v29, %v1436_v27  ;;  %v1448_v29 = vld [vmem:[%s3035_s9 + $0x60] sm:$0xff] }
 0x286   : > { %v1914_v39 = vpop.f32.mrb[2].mxu1  ;;  %1966 = vmatmul.mubr.f32.vlgmr.msra.gmra.mrb[16].mxu0 %v1013_v34 }
 0x287   : > { %v949_v43 = vadd.f32 %v1914_v39, %v1688_v11  ;;  %v943_v25 = vpop.f32.mrb[3].mxu1  ;;  %2142 = vmatprep.subr.bf16.mxu1 %v2141_v33  ;;  %v2776_v39 = vld [vmem:[%s3034_s8] ss:$0 sm:$0xff] }
 0x288   : > { %v944_v37 = vadd.f32 %v1688_v11, %v943_v25  ;;  %2144 = vmatpush3.bf16.msra.mxu1 %v2141_v33 }
 0x289   : > { %v1015_v53 = vmax.f32 %v949_v43, 0.0 }
 0x28a   : > { %v1014_v52 = vmax.f32 %v944_v37, 0.0 }
 0x28c   : > { %1968 = vmatprep.mubr.f32.mxu0 %v1014_v52 }
 0x28d   : > { %1969 = vmatmul.mubr.f32.gmra.mrb[18].mxu0 %v1015_v53 }
 0x28e   : > { %v1917_v48 = vpop.f32.mrb[4].mxu1 }
 0x28f   : > { %v959_v54 = vadd.f32 %v1917_v48, %v1688_v11  ;;  %v953_v40 = vpop.f32.mrb[5].mxu1 }
 0x290   : > { %v954_v8 = vadd.f32 %v1688_v11, %v953_v40 }
 0x291   : > { %v1017_v57 = vmax.f32 %v959_v54, 0.0 }
 0x292   : > { %v1016_v17 = vmax.f32 %v954_v8, 0.0 }
 0x294   : > { %1971 = vmatprep.mubr.f32.mxu0 %v1016_v17 }
 0x295   : > { %1972 = vmatmul.mubr.f32.gmra.mrb[20].mxu0 %v1017_v57 }
 0x296   : > { %v1920_v59 = vpop.f32.mrb[6].mxu1 }
 0x297   : > { %v969_v61 = vadd.f32 %v1920_v59, %v1688_v11  ;;  %v963_v63 = vpop.f32.mrb[7].mxu1 }
 0x298   : > { %v964_v30 = vadd.f32 %v1688_v11, %v963_v63 }
 0x299   : > { %v1019_v51 = vmax.f32 %v969_v61, 0.0 }
 0x29a   : > { %v1018_v21 = vmax.f32 %v964_v30, 0.0 }
 0x29c   : > { %1974 = vmatprep.mubr.f32.mxu0 %v1018_v21 }
 0x29d   : > { %1975 = vmatmul.mubr.f32.gmra.mrb[22].mxu0 %v1019_v51 }
 0x29e   : > { %v1923_v1 = vpop.f32.mrb[8].mxu1 }
 0x29f   : > { %v979_v3 = vadd.f32 %v1923_v1, %v1688_v11  ;;  %v973_v12 = vpop.f32.mrb[9].mxu1 }
 0x2a0   : > { %v974_v6 = vadd.f32 %v1688_v11, %v973_v12  ;;  %v1441_v12 = vld [vmem:[%s3035_s9 + $0x28] sm:$0xff] }
 0x2a1   : > { %v1021_v7 = vmax.f32 %v979_v3, 0.0  ;;  %v1440_v3 = vld [vmem:[%s3035_s9 + $0x20] sm:$0xff] }
 0x2a2   : > { %v1020_v35 = vmax.f32 %v974_v6, 0.0  ;;  %v2149_v6 = vpack.c.bf16 %v1441_v12, %v1440_v3 }
 0x2a4   : > { %1977 = vmatprep.mubr.f32.mxu0 %v1020_v35 }
 0x2a5   : > { %1978 = vmatmul.mubr.f32.gmra.mrb[24].mxu0 %v1021_v7 }
 0x2a6   : > { %v1926_v10 = vpop.f32.mrb[10].mxu1 }
 0x2a7   : > { %v989_v42 = vadd.f32 %v1926_v10, %v1688_v11  ;;  %v983_v13 = vpop.f32.mrb[11].mxu1 }
 0x2a8   : > { %v984_v15 = vadd.f32 %v1688_v11, %v983_v13  ;;  %v1443_v13 = vld [vmem:[%s3035_s9 + $0x38] sm:$0xff] }
 0x2a9   : > { %v1023_v41 = vmax.f32 %v989_v42, 0.0  ;;  %v1442_v42 = vld [vmem:[%s3035_s9 + $0x30] sm:$0xff] }
 0x2aa   : > { %v1022_v16 = vmax.f32 %v984_v15, 0.0 }
 0x2ac   : > { %1980 = vmatprep.mubr.f32.mxu0 %v1022_v16  ;;  %v2153_v16 = vpack.c.bf16 %v1443_v13, %v1442_v42 }
 0x2ad   : > { %1981 = vmatmul.mubr.f32.gmra.mrb[26].mxu0 %v1023_v41 }
 0x2ae   : > { %v1929_v60 = vpop.f32.mrb[12].mxu1 }
 0x2af   : > { %v999_v45 = vadd.f32 %v1929_v60, %v1688_v11  ;;  %v993_v5 = vpop.f32.mrb[13].mxu1 }
 0x2b0   : > { %v994_v18 = vadd.f32 %v1688_v11, %v993_v5  ;;  %v1445_v5 = vld [vmem:[%s3035_s9 + $0x48] sm:$0xff] }
 0x2b1   : > { %v1025_v20 = vmax.f32 %v999_v45, 0.0  ;;  %v1444_v45 = vld [vmem:[%s3035_s9 + $0x40] sm:$0xff] }
 0x2b2   : > { %v1024_v19 = vmax.f32 %v994_v18, 0.0  ;;  %v2157_v18 = vpack.c.bf16 %v1445_v5, %v1444_v45 }
 0x2b4   : > { %1983 = vmatprep.mubr.f32.mxu0 %v1024_v19 }
 0x2b5   : > { %1984 = vmatmul.mubr.f32.gmra.mrb[28].mxu0 %v1025_v20 }
 0x2b6   : > { %v1932_v55 = vpop.f32.mrb[14].mxu1 }
 0x2b7   : > { %v1009_v47 = vadd.f32 %v1932_v55, %v1688_v11  ;;  %v1003_v50 = vpop.f32.mrb[15].mxu1 }
 0x2b8   : > { %v1004_v26 = vadd.f32 %v1688_v11, %v1003_v50  ;;  %v1439_v11 = vld [vmem:[%s3035_s9 + $0x18] sm:$0xff] }
 0x2b9   : > { %v1027_v28 = vmax.f32 %v1009_v47, 0.0  ;;  %v2145_v34 = vpack.c.bf16 %v1439_v11, %v1438_v62  ;;  %v1446_v47 = vld [vmem:[%s3035_s9 + $0x50] sm:$0xff]  ;;  %v1447_v50 = vld [vmem:[%s3035_s9 + $0x58] sm:$0xff]  ;;  %v1449_v62 = vld [vmem:[%s3035_s9 + $0x68] sm:$0xff] }
 0x2ba   : > { %v1026_v22 = vmax.f32 %v1004_v26, 0.0  ;;  %v2165_v33 = vpack.c.bf16 %v1449_v62, %v1448_v29 }
 0x2bb   : > { %2146 = vmatprep.subr.bf16.mxu1 %v2145_v34 }
 0x2bc   : > { %1986 = vmatprep.mubr.f32.mxu0 %v1026_v22  ;;  %2148 = vmatpush3.bf16.msra.mxu1 %v2145_v34  ;;  %v2161_v22 = vpack.c.bf16 %v1447_v50, %v1446_v47 }
 0x2bd   : > { %1987 = vmatmul.mubr.f32.gmra.mrb[30].mxu0 %v1027_v28  ;;  %2150 = vmatprep.subr.bf16.mxu1 %v2149_v6 }
 0x2c0   : > { %2152 = vmatpush3.bf16.msra.mxu1 %v2149_v6 }
 0x2c1   : > { %2154 = vmatprep.subr.bf16.mxu1 %v2153_v16 }
 0x2c4   : > { %2156 = vmatpush3.bf16.msra.mxu1 %v2153_v16 }
 0x2c5   : > { %2158 = vmatprep.subr.bf16.mxu1 %v2157_v18 }
 0x2c8   : > { %2160 = vmatpush3.bf16.msra.mxu1 %v2157_v18 }
 0x2c9   : > { %2162 = vmatprep.subr.bf16.mxu1 %v2161_v22 }
 0x2cc   : > { %2164 = vmatpush3.bf16.msra.mxu1 %v2161_v22 }
 0x2cd   : > { %2166 = vmatprep.subr.bf16.mxu1 %v2165_v33 }
 0x2d0   : > { %2168 = vmatpush3.bf16.msra.mxu1 %v2165_v33 }
 0x359   : > { %v1967_v43 = vpop.f32.mrb[16].mxu0 }
 0x35a   : > { %v1123_v25 = vadd.f32 %v1967_v43, %v2776_v39  ;;  %v1117_v37 = vpop.f32.mrb[17].mxu0 }
 0x35b   : > { %v1118_v52 = vadd.f32 %v2776_v39, %v1117_v37  ;;  %v1451_v37 = vld [vmem:[%s3035_s9 + $0x78] sm:$0xff] }
 0x35c   : > { %v2781_v53 = vadd.f32 %v1123_v25, %v2628_v38  ;;  %v1450_v25 = vld [vmem:[%s3035_s9 + $0x70] sm:$0xff] }
 0x35d   : > { %v2784_v48 = vadd.f32 %v1118_v52, %v2625_v36 }
 0x35e   : > { %1214 = vadd.xlane.f32.xlu1 %v2781_v53  ;;  %v1261_v40 = vmul.f32 %v2781_v53, %v2781_v53 }
 0x35f   : > { %1212 = vadd.xlane.f32.xlu0 %v2784_v48  ;;  %v1260_v57 = vmul.f32 %v2784_v48, %v2784_v48 }
 0x360   : > { %v1970_v54 = vpop.f32.mrb[18].mxu0 }
 0x361   : > { %v1133_v8 = vadd.f32 %v1970_v54, %v2776_v39  ;;  %v1127_v17 = vpop.f32.mrb[19].mxu0  ;;  %v2169_v54 = vpack.c.bf16 %v1451_v37, %v1450_v25 }
 0x362   : > { %v1128_v38 = vadd.f32 %v2776_v39, %v1127_v17  ;;  %1278 = vadd.xlane.f32.xlu1 %v1261_v40 }
 0x363   : > { %v2795_v36 = vadd.f32 %v1133_v8, %v2651_v9  ;;  %1276 = vadd.xlane.f32.xlu0 %v1260_v57  ;;  %2170 = vmatprep.subr.bf16.mxu1 %v2169_v54 }
 0x364   : > { %v2798_v59 = vadd.f32 %v1128_v38, %v2644_v2  ;;  %2172 = vmatpush3.bf16.msra.mxu1 %v2169_v54 }
 0x365   : > { %v1263_v63 = vmul.f32 %v2795_v36, %v2795_v36 }
 0x366   : > { %1218 = vadd.xlane.f32.xlu1 %v2795_v36  ;;  %v1262_v51 = vmul.f32 %v2798_v59, %v2798_v59 }
 0x367   : > { %1216 = vadd.xlane.f32.xlu0 %v2798_v59 }
 0x368   : > { %v1973_v61 = vpop.f32.mrb[20].mxu0 }
 0x369   : > { %v1143_v30 = vadd.f32 %v1973_v61, %v2776_v39  ;;  %v1137_v21 = vpop.f32.mrb[21].mxu0 }
 0x36a   : > { %v1138_v9 = vadd.f32 %v2776_v39, %v1137_v21  ;;  %1282 = vadd.xlane.f32.xlu1 %v1263_v63 }
 0x36b   : > { %v2809_v2 = vadd.f32 %v1143_v30, %v2673_v49  ;;  %1280 = vadd.xlane.f32.xlu0 %v1262_v51 }
 0x36c   : > { %v2812_v1 = vadd.f32 %v1138_v9, %v2666_v0 }
 0x36d   : > { %v1265_v49 = vmul.f32 %v2809_v2, %v2809_v2 }
 0x36e   : > { %1222 = vadd.xlane.f32.xlu1 %v2809_v2  ;;  %v1264_v10 = vmul.f32 %v2812_v1, %v2812_v1 }
 0x36f   : > { %1220 = vadd.xlane.f32.xlu0 %v2812_v1 }
 0x370   : > { %v1976_v35 = vpop.f32.mrb[22].mxu0 }
 0x371   : > { %v1153_v0 = vadd.f32 %v1976_v35, %v2776_v39  ;;  %v1147_v7 = vpop.f32.mrb[23].mxu0 }
 0x372   : > { %v1148_v15 = vadd.f32 %v2776_v39, %v1147_v7  ;;  %1286 = vadd.xlane.f32.xlu1 %v1265_v49 }
 0x373   : > { %v2835_v41 = vadd.f32 %v1153_v0, %v2695_v14  ;;  %1284 = vadd.xlane.f32.xlu0 %v1264_v10 }
 0x374   : > { %v2838_v60 = vadd.f32 %v1148_v15, %v2688_v44 }
 0x375   : > { %v1267_v44 = vmul.f32 %v2835_v41, %v2835_v41 }
 0x376   : > { %1226 = vadd.xlane.f32.xlu1 %v2835_v41  ;;  %v1266_v55 = vmul.f32 %v2838_v60, %v2838_v60 }
 0x377   : > { %1224 = vadd.xlane.f32.xlu0 %v2838_v60 }
 0x378   : > { %v1979_v14 = vpop.f32.mrb[24].mxu0 }
 0x379   : > { %v1163_v19 = vadd.f32 %v1979_v14, %v2776_v39  ;;  %v1157_v20 = vpop.f32.mrb[25].mxu0 }
 0x37a   : > { %v1158_v26 = vadd.f32 %v2776_v39, %v1157_v20  ;;  %1290 = vadd.xlane.f32.xlu1 %v1267_v44 }
 0x37b   : > { %v2861_v28 = vadd.f32 %v1163_v19, %v2711_v32  ;;  %1288 = vadd.xlane.f32.xlu0 %v1266_v55 }
 0x37c   : > { %v2864_v27 = vadd.f32 %v1158_v26, %v2704_v46 }
 0x37d   : > { %v1269_v46 = vmul.f32 %v2861_v28, %v2861_v28 }
 0x37e   : > { %1230 = vadd.xlane.f32.xlu1 %v2861_v28  ;;  %v1268_v43 = vmul.f32 %v2864_v27, %v2864_v27 }
 0x37f   : > { %1228 = vadd.xlane.f32.xlu0 %v2864_v27 }
 0x380   : > { %v1982_v32 = vpop.f32.mrb[26].mxu0 }
 0x381   : > { %v1173_v11 = vadd.f32 %v1982_v32, %v2776_v39  ;;  %v1167_v34 = vpop.f32.mrb[27].mxu0 }
 0x382   : > { %v1168_v52 = vadd.f32 %v2776_v39, %v1167_v34  ;;  %1294 = vadd.xlane.f32.xlu1 %v1269_v46 }
 0x383   : > { %v2887_v40 = vadd.f32 %v1173_v11, %v2725_v31  ;;  %1292 = vadd.xlane.f32.xlu0 %v1268_v43 }
 0x384   : > { %v2890_v8 = vadd.f32 %v1168_v52, %v2718_v4 }
 0x385   : > { %v1271_v57 = vmul.f32 %v2887_v40, %v2887_v40 }
 0x386   : > { %1234 = vadd.xlane.f32.xlu1 %v2887_v40  ;;  %v1270_v31 = vmul.f32 %v2890_v8, %v2890_v8 }
 0x387   : > { %1232 = vadd.xlane.f32.xlu0 %v2890_v8 }
 0x388   : > { %v1985_v17 = vpop.f32.mrb[28].mxu0 }
 0x389   : > { %v1183_v38 = vadd.f32 %v1985_v17, %v2776_v39  ;;  %v1177_v61 = vpop.f32.mrb[29].mxu0 }
 0x38a   : > { %v1178_v63 = vadd.f32 %v2776_v39, %v1177_v61  ;;  %1298 = vadd.xlane.f32.xlu1 %v1271_v57 }
 0x38b   : > { %v2901_v4 = vadd.f32 %v1183_v38, %v2738_v56  ;;  %1296 = vadd.xlane.f32.xlu0 %v1270_v31 }
 0x38c   : > { %v2904_v30 = vadd.f32 %v1178_v63, %v2732_v58 }
 0x38d   : > { %v1273_v51 = vmul.f32 %v2901_v4, %v2901_v4 }
 0x38e   : > { %1238 = vadd.xlane.f32.xlu1 %v2901_v4  ;;  %v1272_v12 = vmul.f32 %v2904_v30, %v2904_v30 }
 0x38f   : > { %1236 = vadd.xlane.f32.xlu0 %v2904_v30 }
 0x390   : > { %v1988_v21 = vpop.f32.mrb[30].mxu0 }
 0x391   : > { %v1193_v9 = vadd.f32 %v1988_v21, %v2776_v39  ;;  %v1187_v3 = vpop.f32.mrb[31].mxu0 }
 0x392   : > { %v1188_v56 = vadd.f32 %v2776_v39, %v1187_v3  ;;  %1302 = vadd.xlane.f32.xlu1 %v1273_v51 }
 0x393   : > { %v2915_v58 = vadd.f32 %v1193_v9, %v2749_v24  ;;  %1300 = vadd.xlane.f32.xlu0 %v1272_v12 }
 0x394   : > { %v2918_v6 = vadd.f32 %v1188_v56, %v2744_v23 }
 0x395   : > { %v1275_v35 = vmul.f32 %v2915_v58, %v2915_v58 }
 0x396   : > { %1242 = vadd.xlane.f32.xlu1 %v2915_v58  ;;  %v1274_v49 = vmul.f32 %v2918_v6, %v2918_v6 }
 0x397   : > { %1240 = vadd.xlane.f32.xlu0 %v2918_v6 }
 0x39a   : > { %1306 = vadd.xlane.f32.xlu1 %v1275_v35 }
 0x39b   : > { %1304 = vadd.xlane.f32.xlu0 %v1274_v49 }
 0x3eb   : > { %v1215_v39 = vpop.xlane.xlu1 %1214 }
 0x3ec   : > { %v1245_v0 = vmul.f32 0.03125, %v1215_v39  ;;  %v1213_v24 = vpop.xlane.xlu0 %1212 }
 0x3ed   : > { %v1244_v7 = vmul.f32 0.03125, %v1213_v24 }
 0x3ee   : > { %v1325_v42 = vmul.f32 %v1245_v0, %v1245_v0  ;;  %v1373_v35 = vsub.f32 %v2781_v53, %v1245_v0 }
 0x3ef   : > { %v1279_v10 = vpop.xlane.xlu1 %1278  ;;  %v1324_v15 = vmul.f32 %v1244_v7, %v1244_v7  ;;  %v1372_v3 = vsub.f32 %v2784_v48, %v1244_v7 }
 0x3f0   : > { %v1309_v23 = vmul.f32 0.03125, %v1279_v10  ;;  %v1277_v13 = vpop.xlane.xlu0 %1276 }
 0x3f1   : > { %v1308_v16 = vmul.f32 0.03125, %v1277_v13 }
 0x3f2   : > { %v1341_v45 = vsub.f32 %v1309_v23, %v1325_v42 }
 0x3f3   : > { %v1340_v5 = vsub.f32 %v1308_v16, %v1324_v15  ;;  %v1219_v18 = vpop.xlane.xlu1 %1218 }
 0x3f4   : > { %v1357_v14 = vmax.f32 %v1341_v45, 0.0  ;;  %v2926_v44 = vmul.f32 0.03125, %v1219_v18  ;;  %v1217_v19 = vpop.xlane.xlu0 %1216 }
 0x3f5   : > { %v1356_v20 = vmax.f32 %v1340_v5, 0.0  ;;  %v2928_v55 = vmul.f32 0.03125, %v1217_v19 }
 0x3f6   : > { %v1389_v47 = vadd.f32 1e-05, %v1357_v14  ;;  %v1327_v22 = vmul.f32 %v2926_v44, %v2926_v44 }
 0x3f7   : > { %v1388_v50 = vadd.f32 1e-05, %v1356_v20  ;;  %v1283_v26 = vpop.xlane.xlu1 %1282  ;;  %v1326_v33 = vmul.f32 %v2928_v55, %v2928_v55  ;;  %v1374_v20 = vsub.f32 %v2798_v59, %v2928_v55 }
 0x3f8   : > { %2213 = vrsqrt.f32 %v1389_v47  ;;  %v1311_v29 = vmul.f32 0.03125, %v1283_v26  ;;  %v1281_v62 = vpop.xlane.xlu0 %1280  ;;  %v1375_v26 = vsub.f32 %v2795_v36, %v2926_v44 }
 0x3f9   : > { %2215 = vrsqrt.f32 %v1388_v50  ;;  %v1310_v32 = vmul.f32 0.03125, %v1281_v62 }
 0x3fa   : > { %v1343_v46 = vsub.f32 %v1311_v29, %v1327_v22 }
 0x3fb   : > { %v1342_v11 = vsub.f32 %v1310_v32, %v1326_v33  ;;  %v1223_v34 = vpop.xlane.xlu1 %1222 }
 0x3fc   : > { %v1359_v43 = vmax.f32 %v1343_v46, 0.0  ;;  %v2934_v25 = vmul.f32 0.03125, %v1223_v34  ;;  %v1221_v37 = vpop.xlane.xlu0 %1220 }
 0x3fd   : > { %v1358_v52 = vmax.f32 %v1342_v11, 0.0  ;;  %v2936_v54 = vmul.f32 0.03125, %v1221_v37 }
 0x3fe   : > { %v1391_v17 = vadd.f32 1e-05, %v1359_v43  ;;  %v1329_v61 = vmul.f32 %v2934_v25, %v2934_v25 }
 0x3ff   : > { %v1390_v57 = vadd.f32 1e-05, %v1358_v52  ;;  %v1287_v38 = vpop.xlane.xlu1 %1286  ;;  %v1328_v21 = vmul.f32 %v2936_v54, %v2936_v54 }
 0x400   : > { %2217 = vrsqrt.f32 %v1391_v17  ;;  %v1313_v31 = vmul.f32 0.03125, %v1287_v38  ;;  %v1285_v63 = vpop.xlane.xlu0 %1284 }
 0x401   : > { %2219 = vrsqrt.f32 %v1390_v57  ;;  %v1312_v51 = vmul.f32 0.03125, %v1285_v63 }
 0x402   : > { %v2214_v9 = vpop.eup %2213  ;;  %v1345_v12 = vsub.f32 %v1313_v31, %v1329_v61  ;;  %v1376_v61 = vsub.f32 %v2812_v1, %v2936_v54 }
 0x403   : > { %v2216_v56 = vpop.eup %2215  ;;  %v1344_v49 = vsub.f32 %v1312_v51, %v1328_v21  ;;  %v1227_v39 = vpop.xlane.xlu1 %1226  ;;  %v1421_v16 = vmul.f32 %v2214_v9, %v1373_v35  ;;  %v1377_v21 = vsub.f32 %v2809_v2, %v2934_v25 }
 0x404   : > { %v1361_v24 = vmax.f32 %v1345_v12, 0.0  ;;  %v2944_v10 = vmul.f32 0.03125, %v1227_v39  ;;  %v1225_v42 = vpop.xlane.xlu0 %1224  ;;  %v1420_v23 = vmul.f32 %v2216_v56, %v1372_v3 }
 0x405   : > { %v1360_v13 = vmax.f32 %v1344_v49, 0.0  ;;  %v2946_v15 = vmul.f32 0.03125, %v1225_v42 }
 0x406   : > { %v1393_v45 = vadd.f32 1e-05, %v1361_v24  ;;  %2021 = vmatprep.mubr.f32.mxu1 %v1420_v23  ;;  %v1331_v53 = vmul.f32 %v2944_v10, %v2944_v10 }
 0x407   : > { %v1392_v5 = vadd.f32 1e-05, %v1360_v13  ;;  %2022 = vmatmul.mubr.f32.vlgmr.msra.gmra.mrb[16].mxu1 %v1421_v16  ;;  %v1291_v48 = vpop.xlane.xlu1 %1290  ;;  %v1330_v18 = vmul.f32 %v2946_v15, %v2946_v15 }
 0x408   : > { %2221 = vrsqrt.f32 %v1393_v45  ;;  %v1315_v0 = vmul.f32 0.03125, %v1291_v48  ;;  %v1289_v7 = vpop.xlane.xlu0 %1288 }
 0x409   : > { %2223 = vrsqrt.f32 %v1392_v5  ;;  %v1314_v14 = vmul.f32 0.03125, %v1289_v7  ;;  %v1378_v5 = vsub.f32 %v2838_v60, %v2946_v15 }
 0x40a   : > { %v2218_v19 = vpop.eup %2217  ;;  %v1347_v47 = vsub.f32 %v1315_v0, %v1331_v53  ;;  %v1379_v0 = vsub.f32 %v2835_v41, %v2944_v10 }
 0x40b   : > { %v2220_v50 = vpop.eup %2219  ;;  %v1346_v22 = vsub.f32 %v1314_v14, %v1330_v18  ;;  %v1231_v29 = vpop.xlane.xlu1 %1230  ;;  %v1423_v43 = vmul.f32 %v2218_v19, %v1375_v26 }
 0x40c   : > { %v1363_v62 = vmax.f32 %v1347_v47, 0.0  ;;  %v2956_v33 = vmul.f32 0.03125, %v1231_v29  ;;  %v1229_v32 = vpop.xlane.xlu0 %1228  ;;  %v1422_v46 = vmul.f32 %v2220_v50, %v1374_v20 }
 0x40d   : > { %v1362_v11 = vmax.f32 %v1346_v22, 0.0  ;;  %v2958_v34 = vmul.f32 0.03125, %v1229_v32 }
 0x40e   : > { %v1395_v37 = vadd.f32 1e-05, %v1363_v62  ;;  %2024 = vmatprep.mubr.f32.mxu1 %v1422_v46  ;;  %v1333_v36 = vmul.f32 %v2956_v33, %v2956_v33 }
 0x40f   : > { %v1394_v52 = vadd.f32 1e-05, %v1362_v11  ;;  %2025 = vmatmul.mubr.f32.gmra.mrb[18].mxu1 %v1423_v43  ;;  %v1295_v59 = vpop.xlane.xlu1 %1294  ;;  %v1332_v17 = vmul.f32 %v2958_v34, %v2958_v34  ;;  %v1380_v43 = vsub.f32 %v2864_v27, %v2958_v34 }
 0x410   : > { %2225 = vrsqrt.f32 %v1395_v37  ;;  %v1317_v44 = vmul.f32 0.03125, %v1295_v59  ;;  %v1293_v55 = vpop.xlane.xlu0 %1292  ;;  %v1381_v59 = vsub.f32 %v2861_v28, %v2956_v33 }
 0x411   : > { %2227 = vrsqrt.f32 %v1394_v52  ;;  %v1316_v57 = vmul.f32 0.03125, %v1293_v55 }
 0x412   : > { %v2222_v38 = vpop.eup %2221  ;;  %v1349_v31 = vsub.f32 %v1317_v44, %v1333_v36 }
 0x413   : > { %v2224_v63 = vpop.eup %2223  ;;  %v1348_v51 = vsub.f32 %v1316_v57, %v1332_v17  ;;  %v1235_v9 = vpop.xlane.xlu1 %1234  ;;  %v1425_v24 = vmul.f32 %v2222_v38, %v1377_v21 }
 0x414   : > { %v1365_v3 = vmax.f32 %v1349_v31, 0.0  ;;  %v2968_v12 = vmul.f32 0.03125, %v1235_v9  ;;  %v1233_v56 = vpop.xlane.xlu0 %1232  ;;  %v1424_v35 = vmul.f32 %v2224_v63, %v1376_v61 }
 0x415   : > { %v1364_v49 = vmax.f32 %v1348_v51, 0.0  ;;  %v2970_v39 = vmul.f32 0.03125, %v1233_v56 }
 0x416   : > { %v1397_v42 = vadd.f32 1e-05, %v1365_v3  ;;  %2027 = vmatprep.mubr.f32.mxu1 %v1424_v35  ;;  %v1335_v2 = vmul.f32 %v2968_v12, %v2968_v12 }
 0x417   : > { %v1396_v23 = vadd.f32 1e-05, %v1364_v49  ;;  %2028 = vmatmul.mubr.f32.gmra.mrb[20].mxu1 %v1425_v24  ;;  %v1299_v1 = vpop.xlane.xlu1 %1298  ;;  %v1334_v13 = vmul.f32 %v2970_v39, %v2970_v39  ;;  %v1382_v35 = vsub.f32 %v2890_v8, %v2970_v39 }
 0x418   : > { %2229 = vrsqrt.f32 %v1397_v42  ;;  %v1319_v25 = vmul.f32 0.03125, %v1299_v1  ;;  %v1297_v54 = vpop.xlane.xlu0 %1296  ;;  %v1383_v42 = vsub.f32 %v2887_v40, %v2968_v12 }
 0x419   : > { %2231 = vrsqrt.f32 %v1396_v23  ;;  %v1318_v16 = vmul.f32 0.03125, %v1297_v54 }
 0x41a   : > { %v2226_v45 = vpop.eup %2225  ;;  %v1351_v48 = vsub.f32 %v1319_v25, %v1335_v2 }
 0x41b   : > { %v2228_v53 = vpop.eup %2227  ;;  %v1350_v7 = vsub.f32 %v1318_v16, %v1334_v13  ;;  %v1239_v18 = vpop.xlane.xlu1 %1238  ;;  %v1427_v22 = vmul.f32 %v2226_v45, %v1379_v0 }
 0x41c   : > { %v1367_v14 = vmax.f32 %v1351_v48, 0.0  ;;  %v2980_v19 = vmul.f32 0.03125, %v1239_v18  ;;  %v1237_v20 = vpop.xlane.xlu0 %1236  ;;  %v1426_v47 = vmul.f32 %v2228_v53, %v1378_v5 }
 0x41d   : > { %v1366_v50 = vmax.f32 %v1350_v7, 0.0  ;;  %v1256_v26 = vmul.f32 0.03125, %v1237_v20 }
 0x41e   : > { %v1399_v29 = vadd.f32 1e-05, %v1367_v14  ;;  %2030 = vmatprep.mubr.f32.mxu1 %v1426_v47  ;;  %v1337_v15 = vmul.f32 %v2980_v19, %v2980_v19  ;;  %v1385_v39 = vsub.f32 %v2901_v4, %v2980_v19 }
 0x41f   : > { %v1398_v62 = vadd.f32 1e-05, %v1366_v50  ;;  %2031 = vmatmul.mubr.f32.gmra.mrb[22].mxu1 %v1427_v22  ;;  %v1303_v60 = vpop.xlane.xlu1 %1302  ;;  %v1336_v32 = vmul.f32 %v1256_v26, %v1256_v26  ;;  %v1384_v5 = vsub.f32 %v2904_v30, %v1256_v26  ;;  %v1690_v30 = vld [vmem:[%s3036_s10] ss:$0 sm:$0xff] }
 0x420   : > { %2233 = vrsqrt.f32 %v1399_v29  ;;  %v1321_v41 = vmul.f32 0.03125, %v1303_v60  ;;  %v1301_v10 = vpop.xlane.xlu0 %1300 }
 0x421   : > { %2235 = vrsqrt.f32 %v1398_v62  ;;  %v1320_v46 = vmul.f32 0.03125, %v1301_v10 }
 0x422   : > { %v2230_v11 = vpop.eup %2229  ;;  %v1353_v37 = vsub.f32 %v1321_v41, %v1337_v15 }
 0x423   : > { %v2232_v52 = vpop.eup %2231  ;;  %v1352_v36 = vsub.f32 %v1320_v46, %v1336_v32  ;;  %v1243_v44 = vpop.xlane.xlu1 %1242  ;;  %v1429_v63 = vmul.f32 %v2230_v11, %v1381_v59 }
 0x424   : > { %v1369_v55 = vmax.f32 %v1353_v37, 0.0  ;;  %v1259_v17 = vmul.f32 0.03125, %v1243_v44  ;;  %v1241_v57 = vpop.xlane.xlu0 %1240  ;;  %v1428_v38 = vmul.f32 %v2232_v52, %v1380_v43 }
 0x425   : > { %v1368_v61 = vmax.f32 %v1352_v36, 0.0  ;;  %v1258_v31 = vmul.f32 0.03125, %v1241_v57 }
 0x426   : > { %v1401_v21 = vadd.f32 1e-05, %v1369_v55  ;;  %2033 = vmatprep.mubr.f32.mxu1 %v1428_v38  ;;  %v1339_v27 = vmul.f32 %v1259_v17, %v1259_v17  ;;  %v1387_v7 = vsub.f32 %v2915_v58, %v1259_v17 }
 0x427   : > { %v1400_v51 = vadd.f32 1e-05, %v1368_v61  ;;  %2034 = vmatmul.mubr.f32.gmra.mrb[24].mxu1 %v1429_v63  ;;  %v1307_v9 = vpop.xlane.xlu1 %1306  ;;  %v1338_v28 = vmul.f32 %v1258_v31, %v1258_v31  ;;  %v1386_v53 = vsub.f32 %v2918_v6, %v1258_v31 }
 0x428   : > { %2237 = vrsqrt.f32 %v1401_v21  ;;  %v1323_v34 = vmul.f32 0.03125, %v1307_v9  ;;  %v1305_v3 = vpop.xlane.xlu0 %1304 }
 0x429   : > { %2239 = vrsqrt.f32 %v1400_v51  ;;  %v1322_v33 = vmul.f32 0.03125, %v1305_v3 }
 0x42a   : > { %v2234_v56 = vpop.eup %2233  ;;  %v1355_v49 = vsub.f32 %v1323_v34, %v1339_v27 }
 0x42b   : > { %v2236_v24 = vpop.eup %2235  ;;  %v1354_v23 = vsub.f32 %v1322_v33, %v1338_v28  ;;  %v1431_v54 = vmul.f32 %v2234_v56, %v1383_v42 }
 0x42c   : > { %v1371_v1 = vmax.f32 %v1355_v49, 0.0  ;;  %v1430_v2 = vmul.f32 %v2236_v24, %v1382_v35 }
 0x42d   : > { %v1370_v25 = vmax.f32 %v1354_v23, 0.0 }
 0x42e   : > { %v1403_v13 = vadd.f32 1e-05, %v1371_v1  ;;  %2036 = vmatprep.mubr.f32.mxu1 %v1430_v2 }
 0x42f   : > { %v1402_v16 = vadd.f32 1e-05, %v1370_v25  ;;  %2037 = vmatmul.mubr.f32.gmra.mrb[26].mxu1 %v1431_v54 }
 0x430   : > { %2241 = vrsqrt.f32 %v1403_v13 }
 0x431   : > { %2243 = vrsqrt.f32 %v1402_v16 }
 0x432   : > { %v2238_v45 = vpop.eup %2237 }
 0x433   : > { %v2240_v8 = vpop.eup %2239  ;;  %v1433_v12 = vmul.f32 %v2238_v45, %v1385_v39 }
 0x434   : > { %v1432_v40 = vmul.f32 %v2240_v8, %v1384_v5 }
 0x436   : > { %2039 = vmatprep.mubr.f32.mxu1 %v1432_v40 }
 0x437   : > { %2040 = vmatmul.mubr.f32.gmra.mrb[28].mxu1 %v1433_v12 }
 0x43a   : > { %v2242_v48 = vpop.eup %2241 }
 0x43b   : > { %v2244_v0 = vpop.eup %2243  ;;  %v1435_v14 = vmul.f32 %v2242_v48, %v1387_v7 }
 0x43c   : > { %v1434_v18 = vmul.f32 %v2244_v0, %v1386_v53 }
 0x43e   : > { %2042 = vmatprep.mubr.f32.mxu1 %v1434_v18 }
 0x43f   : > { %2043 = vmatmul.mubr.f32.gmra.mrb[30].mxu1 %v1435_v14 }
 0x4da   : > { %v2023_v4 = vpop.f32.mrb[16].mxu1 }
 0x4db   : > { %v1531_v58 = vadd.f32 %v2023_v4, %v1690_v30  ;;  %v1525_v6 = vpop.f32.mrb[17].mxu1 }
 0x4dc   : > { %v1526_v19 = vadd.f32 %v1690_v30, %v1525_v6 }
 0x4dd   : > { %1605 = vst [vmem:[%s3005_s20 + $0x8] sm:$0xff] %v1531_v58 }
 0x4de   : > { %1604 = vst [vmem:[%s3005_s20] sm:$0xff] %v1526_v19 }
 0x4e2   : > { %v2026_v20 = vpop.f32.mrb[18].mxu1 }
 0x4e3   : > { %v1541_v47 = vadd.f32 %v2026_v20, %v1690_v30  ;;  %v1535_v50 = vpop.f32.mrb[19].mxu1 }
 0x4e4   : > { %v1536_v26 = vadd.f32 %v1690_v30, %v1535_v50 }
 0x4e5   : > { %1607 = vst [vmem:[%s3005_s20 + $0x18] sm:$0xff] %v1541_v47 }
 0x4e6   : > { %1606 = vst [vmem:[%s3005_s20 + $0x10] sm:$0xff] %v1536_v26 }
 0x4ea   : > { %v2029_v22 = vpop.f32.mrb[20].mxu1 }
 0x4eb   : > { %v1551_v29 = vadd.f32 %v2029_v22, %v1690_v30  ;;  %v1545_v62 = vpop.f32.mrb[21].mxu1 }
 0x4ec   : > { %v1546_v60 = vadd.f32 %v1690_v30, %v1545_v62 }
 0x4ed   : > { %1609 = vst [vmem:[%s3005_s20 + $0x28] sm:$0xff] %v1551_v29 }
 0x4ee   : > { %1608 = vst [vmem:[%s3005_s20 + $0x20] sm:$0xff] %v1546_v60 }
 0x4f2   : > { %v2032_v15 = vpop.f32.mrb[22].mxu1 }
 0x4f3   : > { %v1561_v41 = vadd.f32 %v2032_v15, %v1690_v30  ;;  %v1555_v10 = vpop.f32.mrb[23].mxu1 }
 0x4f4   : > { %v1556_v32 = vadd.f32 %v1690_v30, %v1555_v10 }
 0x4f5   : > { %1611 = vst [vmem:[%s3005_s20 + $0x38] sm:$0xff] %v1561_v41 }
 0x4f6   : > { %1610 = vst [vmem:[%s3005_s20 + $0x30] sm:$0xff] %v1556_v32 }
 0x4fa   : > { %v2035_v46 = vpop.f32.mrb[24].mxu1 }
 0x4fb   : > { %v1571_v11 = vadd.f32 %v2035_v46, %v1690_v30  ;;  %v1565_v43 = vpop.f32.mrb[25].mxu1 }
 0x4fc   : > { %v1566_v37 = vadd.f32 %v1690_v30, %v1565_v43 }
 0x4fd   : > { %1613 = vst [vmem:[%s3005_s20 + $0x48] sm:$0xff] %v1571_v11 }
 0x4fe   : > { %1612 = vst [vmem:[%s3005_s20 + $0x40] sm:$0xff] %v1566_v37 }
 0x502   : > { %v2038_v52 = vpop.f32.mrb[26].mxu1 }
 0x503   : > { %v1581_v59 = vadd.f32 %v2038_v52, %v1690_v30  ;;  %v1575_v36 = vpop.f32.mrb[27].mxu1 }
 0x504   : > { %v1576_v44 = vadd.f32 %v1690_v30, %v1575_v36 }
 0x505   : > { %1615 = vst [vmem:[%s3005_s20 + $0x58] sm:$0xff] %v1581_v59 }
 0x506   : > { %1614 = vst [vmem:[%s3005_s20 + $0x50] sm:$0xff] %v1576_v44 }
 0x50a   : > { %v2041_v55 = vpop.f32.mrb[28].mxu1 }
 0x50b   : > { %v1591_v17 = vadd.f32 %v2041_v55, %v1690_v30  ;;  %v1585_v57 = vpop.f32.mrb[29].mxu1 }
 0x50c   : > { %v1586_v38 = vadd.f32 %v1690_v30, %v1585_v57 }
 0x50d   : > { %1617 = vst [vmem:[%s3005_s20 + $0x68] sm:$0xff] %v1591_v17 }
 0x50e   : > { %1616 = vst [vmem:[%s3005_s20 + $0x60] sm:$0xff] %v1586_v38 }
 0x512   : > { %v2044_v61 = vpop.f32.mrb[30].mxu1 }
 0x513   : > { %v1601_v31 = vadd.f32 %v2044_v61, %v1690_v30  ;;  %v1595_v63 = vpop.f32.mrb[31].mxu1 }
 0x514   : > { %v1596_v21 = vadd.f32 %v1690_v30, %v1595_v63 }
 0x515   : > { %1619 = vst [vmem:[%s3005_s20 + $0x78] sm:$0xff] %v1601_v31 }
 0x516   : > { %1618 = vst [vmem:[%s3005_s20 + $0x70] sm:$0xff] %v1596_v21 }
 0x517 PF: > { %s21_s17 = sadd.s32 1, %s2251_s17  }
 0x518   : > { %p18_p4 = scmp.ge.s32.totalorder %s21_s17, 4  }
 0x51a   :  { %20 = sbr.rel (!%p18_p4) target bundleno = 1 (0x1), region = 94 }

</bundles_post_ra>
